<compile_context>
chip_gen: v5e
topology: v5e:2x2
jax: 0.10.0
libtpu: 0.0.40
codegen_flags: <defaults>
</compile_context>

<pallas_src>
import functools
import math

import jax
import jax.numpy as jnp
from jax.experimental import pallas as pl
from jax.experimental.pallas import tpu as pltpu


def _purity_kernel(q_ref, ft_ref, fn2_ref, cls_ref, out_ref,
                   best_d_ref, best_c_ref,
                   *, mb, ts, k_neighbors, kc, num_classes, inv_log_nc):
    """One (query-tile i, neighbor-tile j) grid step.

    q_ref   : (MB, C)          query features (compute dtype)
    ft_ref  : (C, TS)          neighbor-tile features, pre-transposed (compute dtype)
    fn2_ref : (NT, TS)         squared norms of all neighbors, f32 (grid-invariant)
    cls_ref : (NT, TS)         class id of all neighbors as f32   (grid-invariant)
    out_ref : (1, MB)          normalized neighbor-class entropy (written at last j)
    best_d_ref, best_c_ref : (MB, KC) f32 running top-k scratch (first k cols live)
    """
    j = pl.program_id(1)
    nj = pl.num_programs(1)

    @pl.when(j == 0)
    def _init():
        best_d_ref[...] = jnp.full((mb, kc), jnp.inf, jnp.float32)
        best_c_ref[...] = jnp.zeros((mb, kc), jnp.float32)

    # Distance matmul in canonical NN form on the MXU: (MB, C) x (C, TS).
    cross = jnp.dot(q_ref[...], ft_ref[...],
                    preferred_element_type=jnp.float32)           # (MB, TS) f32

    fn2 = fn2_ref[pl.ds(j, 1), :]                                  # (1, TS) f32
    cls = cls_ref[pl.ds(j, 1), :]                                  # (1, TS) f32

    # Per-row ordering-equivalent to the clamped squared Euclidean distance.
    score = fn2 - 2.0 * cross                                      # (MB, TS) f32

    # Merge this tile's candidates with the running best-k (concatenation order
    # == global column order, so first-occurrence tie-break matches sort-first-k).
    d_ext = jnp.concatenate([best_d_ref[...], score], axis=-1)     # (MB, KC+TS)
    c_ext = jnp.concatenate(
        [best_c_ref[...], jnp.broadcast_to(cls, (mb, ts))], axis=-1)

    total = kc + ts
    col = jax.lax.broadcasted_iota(jnp.int32, (mb, total), 1)
    inf = jnp.float32(jnp.inf)

    new_d = []
    new_c = []
    for _ in range(k_neighbors):
        m = jnp.min(d_ext, axis=-1, keepdims=True)                 # (MB, 1)
        first = jnp.min(jnp.where(d_ext <= m, col, total),
                        axis=-1, keepdims=True)                    # first occurrence
        mask = col == first                                        # (MB, total) bool
        new_d.append(m)
        new_c.append(jnp.sum(jnp.where(mask, c_ext, 0.0),
                             axis=-1, keepdims=True))              # class of selected
        d_ext = jnp.where(mask, inf, d_ext)                        # knock out chosen col

    pad = kc - k_neighbors
    best_d_ref[...] = jnp.concatenate(
        new_d + [jnp.full((mb, pad), jnp.inf, jnp.float32)], axis=-1)
    best_c_ref[...] = jnp.concatenate(
        new_c + [jnp.zeros((mb, pad), jnp.float32)], axis=-1)

    @pl.when(j == nj - 1)
    def _finalize():
        # Histogram of the k selected classes (tiny (MB, NC) arrays).
        class_iota = jax.lax.broadcasted_iota(jnp.int32, (mb, num_classes), 1)
        counts = jnp.zeros((mb, num_classes), jnp.float32)
        for t in range(k_neighbors):
            counts = counts + (class_iota == new_c[t].astype(jnp.int32)
                               ).astype(jnp.float32)
        # region_count == k_neighbors exactly.
        p = counts * (1.0 / k_neighbors)
        e = -p * jnp.log(p + 1e-6)                                 # (MB, NC)
        # Class-sum via a tiny matmul so the result lands lane-dense as (1, MB).
        ones = jnp.ones((1, num_classes), jnp.float32)
        ent = jax.lax.dot_general(ones, e, (((1,), (1,)), ((), ())),
                                  preferred_element_type=jnp.float32)  # (1, MB)
        out_ref[...] = (ent * inv_log_nc).astype(out_ref.dtype)


def _ceil_to(x, m):
    return ((x + m - 1) // m) * m


def feature_space_region_score(
    features,             # (1, C, H, W)  NCHW, like torch
    outputs,              # (1, NC, H, W) class logits
    sample_key,
    *,
    input_size=(16, 16),
    row_ratio=4,
    col_ratio=4,
    minibatch_size=None,          # None -> auto (<=128 query rows per tile)
    neighbor_tile=2048,           # neighbor-axis tile (multiple of 128)
    num_classes=19,
    feature_neibor_length=9,
    compute_dtype=jnp.bfloat16,   # pass jnp.float32 for bit-closer torch agreement
):
    b, c, h, w = features.shape
    assert b == 1, "module semantics assume batch 1 (view(1, h*w, C))"
    row = input_size[0] // row_ratio
    col = input_size[1] // col_ratio
    n_samples = row * col
    full = input_size[0] * input_size[1]
    k = feature_neibor_length
    assert n_samples >= k, "need at least k sampled points for k-NN"

    # --- query tiling (results are independent of the minibatch partition) ---
    if minibatch_size is None:
        # MB=128: megacore-friendly (>=2 tiles on v7x for any S>128), fits v5e VMEM.
        mb = _ceil_to(min(n_samples, 128), 8)
    else:
        mb = _ceil_to(min(minibatch_size, _ceil_to(n_samples, 8)), 8)
        if mb > 128:
            mb = _ceil_to(mb, 128)
    sq = _ceil_to(n_samples, mb)            # padded query count
    n_q_tiles = sq // mb

    # --- neighbor tiling (bounds VMEM; pipelines the feature DMA) ---
    assert neighbor_tile % 128 == 0
    ts = min(neighbor_tile, _ceil_to(n_samples, 128))
    sn = _ceil_to(n_samples, ts)            # padded neighbor count
    n_n_tiles = sn // ts

    # random.sample(range(h*w), row*col) -> sorted  (host RNG replaced by jax.random)
    sample_index = jnp.sort(
        jax.random.choice(sample_key, h * w, shape=(n_samples,), replace=False))

    # NHWC flatten + gather sampled rows: (S, C)
    feats = jnp.transpose(features, (0, 2, 3, 1)).reshape(h * w, c)[sample_index]
    feats_c = feats.astype(compute_dtype)
    feats_f32 = feats_c.astype(jnp.float32)   # same values the MXU sees

    # argmax(softmax(logits)) == argmax(logits) over the class axis
    class_ids = jnp.argmax(outputs[0], axis=0).reshape(h * w)[sample_index]  # (S,)

    # Queries, padded to SQ rows (padded rows produce garbage that is dropped).
    q_arr = jnp.zeros((sq, c), compute_dtype).at[:n_samples].set(feats_c)
    # Neighbors, pre-transposed (C, SN); padded columns get a huge ||f||^2 sentinel.
    ft_arr = jnp.zeros((c, sn), compute_dtype).at[:, :n_samples].set(feats_c.T)
    fn2_flat = jnp.full((sn,), 1e30, jnp.float32).at[:n_samples].set(
        jnp.sum(feats_f32 * feats_f32, axis=-1))
    cls_flat = jnp.zeros((sn,), jnp.float32).at[:n_samples].set(
        class_ids.astype(jnp.float32))
    fn2_t = fn2_flat.reshape(n_n_tiles, ts)
    cls_t = cls_flat.reshape(n_n_tiles, ts)

    kc = 128  # lane-padded width of the running best-k scratch
    kernel = functools.partial(
        _purity_kernel, mb=mb, ts=ts, k_neighbors=k, kc=kc,
        num_classes=num_classes, inv_log_nc=1.0 / math.log(num_classes))

    # Explicit scoped-VMEM limit (v5e default is 16 MiB; keep <= 64 MiB for v7x).
    itemsize = jnp.dtype(compute_dtype).itemsize
    est = (2 * c * ts * itemsize            # (C, TS) feature tile, double-buffered
           + 2 * mb * c * itemsize          # query block
           + 2 * n_n_tiles * ts * 4         # fn2 + cls, single-buffered
           + 8 * mb * (ts + kc) * 4         # merge intermediates
           + 4 * mb * kc * 4                # best-k scratch + finalize temporaries
           + 2 * mb * 4)                    # output block
    vmem_limit = int(min(max(2 * est, 32 * 1024 * 1024), 64 * 1024 * 1024))

    purity = pl.pallas_call(
        kernel,
        out_shape=jax.ShapeDtypeStruct((1, sq), jnp.float32),
        grid=(n_q_tiles, n_n_tiles),
        in_specs=[
            # query block: changes with the (parallel) query axis only
            pl.BlockSpec((mb, c), lambda i, j: (i, 0)),
            # neighbor feature tile: changes every inner step -> default double buffer
            pl.BlockSpec((c, ts), lambda i, j: (0, j)),
            # grid-invariant, tiny: keep resident, single-buffered
            pl.BlockSpec((n_n_tiles, ts), lambda i, j: (0, 0),
                         pipeline_mode=pl.Buffered(1)),
            pl.BlockSpec((n_n_tiles, ts), lambda i, j: (0, 0),
                         pipeline_mode=pl.Buffered(1)),
        ],
        out_specs=pl.BlockSpec((1, mb), lambda i, j: (0, i)),   # lane-dense output
        scratch_shapes=[pltpu.VMEM((mb, kc), jnp.float32),      # best distances
                        pltpu.VMEM((mb, kc), jnp.float32)],     # best class ids
        compiler_params=pltpu.CompilerParams(
            dimension_semantics=("parallel", "arbitrary"),
            vmem_limit_bytes=vmem_limit),
    )(q_arr, ft_arr, fn2_t, cls_t)[0, :n_samples]               # drop query padding

    # scatter into the full-resolution map (torch .scatter along the flattened dim)
    full_score = jnp.zeros((full,), jnp.float32).at[sample_index].set(purity)
    return full_score.reshape(input_size[0], input_size[1])


if __name__ == "__main__":
    key = jax.random.PRNGKey(0)
    k_feat, k_out, k_sample = jax.random.split(key, 3)

    # Small shapes consistent with the module: b=1, C=128 (512 in the original,
    # parameterized here), feature map 16x16, 19 classes, input_size=(16,16),
    # row_ratio=col_ratio=4 -> 16 sampled points.
    b, c, h, w = 1, 128, 16, 16
    num_classes = 19

    features = jax.random.normal(k_feat, (b, c, h, w), dtype=jnp.float32)
    outputs = jax.random.normal(k_out, (1, num_classes, h, w), dtype=jnp.float32)

    result = feature_space_region_score(
        features,
        outputs,
        k_sample,
        input_size=(16, 16),
        row_ratio=4,
        col_ratio=4,
        num_classes=num_classes,
        feature_neibor_length=9,
    )
    jax.block_until_ready(result)
    assert result.shape == (16, 16) and result.dtype == jnp.float32
    assert bool(jnp.all(jnp.isfinite(result)))
    print("KERNEL_OK")
</pallas_src>

<mosaic_0001>
module attributes {stable_mosaic.version = 11 : i64} {
  func.func @_purity_kernel(%arg0: i32, %arg1: i32, %arg2: memref<16x128xbf16, #tpu.memory_space<vmem>>, %arg3: memref<128x128xbf16, #tpu.memory_space<vmem>>, %arg4: memref<1x128xf32, #tpu.memory_space<vmem>>, %arg5: memref<1x128xf32, #tpu.memory_space<vmem>>, %arg6: memref<1x16xf32, #tpu.memory_space<vmem>>, %arg7: memref<16x128xf32, #tpu.memory_space<vmem>>, %arg8: memref<16x128xf32, #tpu.memory_space<vmem>>) attributes {dimension_semantics = [#tpu.dimension_semantics<parallel>, #tpu.dimension_semantics<arbitrary>], iteration_bounds = array<i64: 1, 1>, scalar_prefetch = 0 : i64, scratch_operands = 2 : i64, tpu.core_type = #tpu.core_type<tc>, window_params = [{transform_indices = @transform_0, window_bounds = array<i64: 16, 128>}, {transform_indices = @transform_1, window_bounds = array<i64: 128, 128>}, {pipeline_mode = #tpu.pipeline_mode<synchronous>, transform_indices = @transform_2, window_bounds = array<i64: 1, 128>}, {pipeline_mode = #tpu.pipeline_mode<synchronous>, transform_indices = @transform_3, window_bounds = array<i64: 1, 128>}, {transform_indices = @transform_4, window_bounds = array<i64: 1, 16>}]} {
    %c0_i32 = arith.constant 0 : i32
    %0 = arith.cmpi eq, %arg1, %c0_i32 : i32
    %1 = arith.extui %0 : i1 to i32
    %c0_i32_0 = arith.constant 0 : i32
    %2 = arith.cmpi ne, %1, %c0_i32_0 : i32
    scf.if %2 {
      %cst_71 = arith.constant 0x7F800000 : f32
      %172 = vector.broadcast %cst_71 : f32 to vector<16x128xf32>
      %c0_72 = arith.constant 0 : index
      %c0_73 = arith.constant 0 : index
      %173 = vector.load %arg7[%c0_72, %c0_73] : memref<16x128xf32, #tpu.memory_space<vmem>>, vector<16x128xf32>
      tpu.vector_store %arg7[%c0_72, %c0_73], %172 {strides = array<i32>} : memref<16x128xf32, #tpu.memory_space<vmem>>, vector<16x128xf32>,
      %cst_74 = arith.constant 0.000000e+00 : f32
      %174 = vector.broadcast %cst_74 : f32 to vector<16x128xf32>
      %c0_75 = arith.constant 0 : index
      %c0_76 = arith.constant 0 : index
      %175 = vector.load %arg8[%c0_75, %c0_76] : memref<16x128xf32, #tpu.memory_space<vmem>>, vector<16x128xf32>
      tpu.vector_store %arg8[%c0_75, %c0_76], %174 {strides = array<i32>} : memref<16x128xf32, #tpu.memory_space<vmem>>, vector<16x128xf32>,
    } else {
    }
    %c0 = arith.constant 0 : index
    %c0_1 = arith.constant 0 : index
    %3 = vector.load %arg2[%c0, %c0_1] : memref<16x128xbf16, #tpu.memory_space<vmem>>, vector<16x128xbf16>
    %c0_2 = arith.constant 0 : index
    %c0_3 = arith.constant 0 : index
    %4 = vector.load %arg3[%c0_2, %c0_3] : memref<128x128xbf16, #tpu.memory_space<vmem>>, vector<128x128xbf16>
    %cst = arith.constant dense<0.000000e+00> : vector<16x128xf32>
    %5 = tpu.matmul %3, %4, %cst {dimension_numbers = #tpu.dot_dimension_numbers<[1], [0], [0], [1], [0, 0, 1, 1], [], []>} : vector<16x128xbf16>, vector<128x128xbf16>, vector<16x128xf32> -> vector<16x128xf32>
    %6 = arith.index_cast %arg1 : i32 to index
    %c0_4 = arith.constant 0 : index
    %7 = vector.load %arg4[%6, %c0_4] : memref<1x128xf32, #tpu.memory_space<vmem>>, vector<1x128xf32>
    %8 = arith.index_cast %arg1 : i32 to index
    %c0_5 = arith.constant 0 : index
    %9 = vector.load %arg5[%8, %c0_5] : memref<1x128xf32, #tpu.memory_space<vmem>>, vector<1x128xf32>
    %cst_6 = arith.constant 2.000000e+00 : f32
    %10 = vector.broadcast %cst_6 : f32 to vector<16x128xf32>
    %11 = arith.mulf %10, %5 : vector<16x128xf32>
    %12 = vector.broadcast %7 : vector<1x128xf32> to vector<16x128xf32>
    %13 = arith.subf %12, %11 : vector<16x128xf32>
    %c0_7 = arith.constant 0 : index
    %c0_8 = arith.constant 0 : index
    %14 = vector.load %arg7[%c0_7, %c0_8] : memref<16x128xf32, #tpu.memory_space<vmem>>, vector<16x128xf32>
    %15 = tpu.concatenate %14, %13 in 1 : vector<16x128xf32>, vector<16x128xf32> -> vector<16x256xf32>
    %c0_9 = arith.constant 0 : index
    %c0_10 = arith.constant 0 : index
    %16 = vector.load %arg8[%c0_9, %c0_10] : memref<16x128xf32, #tpu.memory_space<vmem>>, vector<16x128xf32>
    %17 = vector.shape_cast %9 : vector<1x128xf32> to vector<1x128xf32>
    %18 = vector.broadcast %17 : vector<1x128xf32> to vector<16x128xf32>
    %19 = tpu.concatenate %16, %18 in 1 : vector<16x128xf32>, vector<16x128xf32> -> vector<16x256xf32>
    %20 = tpu.iota {dimensions = array<i32: 1>} : vector<16x256xi32>
    %cst_11 = arith.constant dense<0x7F800000> : vector<16xf32>
    %21 = vector.multi_reduction <minimumf>, %15, %cst_11 [1] : vector<16x256xf32> to vector<16xf32>
    %22 = vector.shape_cast %21 : vector<16xf32> to vector<16x1xf32>
    %23 = vector.broadcast %22 : vector<16x1xf32> to vector<16x256xf32>
    %24 = arith.cmpf ole, %15, %23 : vector<16x256xf32>
    %c256_i32 = arith.constant 256 : i32
    %25 = vector.broadcast %c256_i32 : i32 to vector<16x256xi32>
    %26 = arith.select %24, %20, %25 : vector<16x256xi1>, vector<16x256xi32>
    %cst_12 = arith.constant dense<2147483647> : vector<16xi32>
    %27 = vector.multi_reduction <minsi>, %26, %cst_12 [1] : vector<16x256xi32> to vector<16xi32>
    %28 = vector.shape_cast %27 : vector<16xi32> to vector<16x1xi32>
    %29 = vector.broadcast %28 : vector<16x1xi32> to vector<16x256xi32>
    %30 = arith.cmpi eq, %20, %29 : vector<16x256xi32>
    %cst_13 = arith.constant 0.000000e+00 : f32
    %31 = vector.broadcast %cst_13 : f32 to vector<16x256xf32>
    %32 = arith.select %30, %19, %31 : vector<16x256xi1>, vector<16x256xf32>
    %cst_14 = arith.constant dense<0.000000e+00> : vector<16xf32>
    %33 = vector.multi_reduction <add>, %32, %cst_14 [1] : vector<16x256xf32> to vector<16xf32>
    %34 = vector.shape_cast %33 : vector<16xf32> to vector<16x1xf32>
    %cst_15 = arith.constant 0x7F800000 : f32
    %35 = vector.broadcast %cst_15 : f32 to vector<16x256xf32>
    %36 = arith.select %30, %35, %15 : vector<16x256xi1>, vector<16x256xf32>
    %cst_16 = arith.constant dense<0x7F800000> : vector<16xf32>
    %37 = vector.multi_reduction <minimumf>, %36, %cst_16 [1] : vector<16x256xf32> to vector<16xf32>
    %38 = vector.shape_cast %37 : vector<16xf32> to vector<16x1xf32>
    %39 = vector.broadcast %38 : vector<16x1xf32> to vector<16x256xf32>
    %40 = arith.cmpf ole, %36, %39 : vector<16x256xf32>
    %c256_i32_17 = arith.constant 256 : i32
    %41 = vector.broadcast %c256_i32_17 : i32 to vector<16x256xi32>
    %42 = arith.select %40, %20, %41 : vector<16x256xi1>, vector<16x256xi32>
    %cst_18 = arith.constant dense<2147483647> : vector<16xi32>
    %43 = vector.multi_reduction <minsi>, %42, %cst_18 [1] : vector<16x256xi32> to vector<16xi32>
    %44 = vector.shape_cast %43 : vector<16xi32> to vector<16x1xi32>
    %45 = vector.broadcast %44 : vector<16x1xi32> to vector<16x256xi32>
    %46 = arith.cmpi eq, %20, %45 : vector<16x256xi32>
    %cst_19 = arith.constant 0.000000e+00 : f32
    %47 = vector.broadcast %cst_19 : f32 to vector<16x256xf32>
    %48 = arith.select %46, %19, %47 : vector<16x256xi1>, vector<16x256xf32>
    %cst_20 = arith.constant dense<0.000000e+00> : vector<16xf32>
    %49 = vector.multi_reduction <add>, %48, %cst_20 [1] : vector<16x256xf32> to vector<16xf32>
    %50 = vector.shape_cast %49 : vector<16xf32> to vector<16x1xf32>
    %cst_21 = arith.constant 0x7F800000 : f32
    %51 = vector.broadcast %cst_21 : f32 to vector<16x256xf32>
    %52 = arith.select %46, %51, %36 : vector<16x256xi1>, vector<16x256xf32>
    %cst_22 = arith.constant dense<0x7F800000> : vector<16xf32>
    %53 = vector.multi_reduction <minimumf>, %52, %cst_22 [1] : vector<16x256xf32> to vector<16xf32>
    %54 = vector.shape_cast %53 : vector<16xf32> to vector<16x1xf32>
    %55 = vector.broadcast %54 : vector<16x1xf32> to vector<16x256xf32>
    %56 = arith.cmpf ole, %52, %55 : vector<16x256xf32>
    %c256_i32_23 = arith.constant 256 : i32
    %57 = vector.broadcast %c256_i32_23 : i32 to vector<16x256xi32>
    %58 = arith.select %56, %20, %57 : vector<16x256xi1>, vector<16x256xi32>
    %cst_24 = arith.constant dense<2147483647> : vector<16xi32>
    %59 = vector.multi_reduction <minsi>, %58, %cst_24 [1] : vector<16x256xi32> to vector<16xi32>
    %60 = vector.shape_cast %59 : vector<16xi32> to vector<16x1xi32>
    %61 = vector.broadcast %60 : vector<16x1xi32> to vector<16x256xi32>
    %62 = arith.cmpi eq, %20, %61 : vector<16x256xi32>
    %cst_25 = arith.constant 0.000000e+00 : f32
    %63 = vector.broadcast %cst_25 : f32 to vector<16x256xf32>
    %64 = arith.select %62, %19, %63 : vector<16x256xi1>, vector<16x256xf32>
    %cst_26 = arith.constant dense<0.000000e+00> : vector<16xf32>
    %65 = vector.multi_reduction <add>, %64, %cst_26 [1] : vector<16x256xf32> to vector<16xf32>
    %66 = vector.shape_cast %65 : vector<16xf32> to vector<16x1xf32>
    %cst_27 = arith.constant 0x7F800000 : f32
    %67 = vector.broadcast %cst_27 : f32 to vector<16x256xf32>
    %68 = arith.select %62, %67, %52 : vector<16x256xi1>, vector<16x256xf32>
    %cst_28 = arith.constant dense<0x7F800000> : vector<16xf32>
    %69 = vector.multi_reduction <minimumf>, %68, %cst_28 [1] : vector<16x256xf32> to vector<16xf32>
    %70 = vector.shape_cast %69 : vector<16xf32> to vector<16x1xf32>
    %71 = vector.broadcast %70 : vector<16x1xf32> to vector<16x256xf32>
    %72 = arith.cmpf ole, %68, %71 : vector<16x256xf32>
    %c256_i32_29 = arith.constant 256 : i32
    %73 = vector.broadcast %c256_i32_29 : i32 to vector<16x256xi32>
    %74 = arith.select %72, %20, %73 : vector<16x256xi1>, vector<16x256xi32>
    %cst_30 = arith.constant dense<2147483647> : vector<16xi32>
    %75 = vector.multi_reduction <minsi>, %74, %cst_30 [1] : vector<16x256xi32> to vector<16xi32>
    %76 = vector.shape_cast %75 : vector<16xi32> to vector<16x1xi32>
    %77 = vector.broadcast %76 : vector<16x1xi32> to vector<16x256xi32>
    %78 = arith.cmpi eq, %20, %77 : vector<16x256xi32>
    %cst_31 = arith.constant 0.000000e+00 : f32
    %79 = vector.broadcast %cst_31 : f32 to vector<16x256xf32>
    %80 = arith.select %78, %19, %79 : vector<16x256xi1>, vector<16x256xf32>
    %cst_32 = arith.constant dense<0.000000e+00> : vector<16xf32>
    %81 = vector.multi_reduction <add>, %80, %cst_32 [1] : vector<16x256xf32> to vector<16xf32>
    %82 = vector.shape_cast %81 : vector<16xf32> to vector<16x1xf32>
    %cst_33 = arith.constant 0x7F800000 : f32
    %83 = vector.broadcast %cst_33 : f32 to vector<16x256xf32>
    %84 = arith.select %78, %83, %68 : vector<16x256xi1>, vector<16x256xf32>
    %cst_34 = arith.constant dense<0x7F800000> : vector<16xf32>
    %85 = vector.multi_reduction <minimumf>, %84, %cst_34 [1] : vector<16x256xf32> to vector<16xf32>
    %86 = vector.shape_cast %85 : vector<16xf32> to vector<16x1xf32>
    %87 = vector.broadcast %86 : vector<16x1xf32> to vector<16x256xf32>
    %88 = arith.cmpf ole, %84, %87 : vector<16x256xf32>
    %c256_i32_35 = arith.constant 256 : i32
    %89 = vector.broadcast %c256_i32_35 : i32 to vector<16x256xi32>
    %90 = arith.select %88, %20, %89 : vector<16x256xi1>, vector<16x256xi32>
    %cst_36 = arith.constant dense<2147483647> : vector<16xi32>
    %91 = vector.multi_reduction <minsi>, %90, %cst_36 [1] : vector<16x256xi32> to vector<16xi32>
    %92 = vector.shape_cast %91 : vector<16xi32> to vector<16x1xi32>
    %93 = vector.broadcast %92 : vector<16x1xi32> to vector<16x256xi32>
    %94 = arith.cmpi eq, %20, %93 : vector<16x256xi32>
    %cst_37 = arith.constant 0.000000e+00 : f32
    %95 = vector.broadcast %cst_37 : f32 to vector<16x256xf32>
    %96 = arith.select %94, %19, %95 : vector<16x256xi1>, vector<16x256xf32>
    %cst_38 = arith.constant dense<0.000000e+00> : vector<16xf32>
    %97 = vector.multi_reduction <add>, %96, %cst_38 [1] : vector<16x256xf32> to vector<16xf32>
    %98 = vector.shape_cast %97 : vector<16xf32> to vector<16x1xf32>
    %cst_39 = arith.constant 0x7F800000 : f32
    %99 = vector.broadcast %cst_39 : f32 to vector<16x256xf32>
    %100 = arith.select %94, %99, %84 : vector<16x256xi1>, vector<16x256xf32>
    %cst_40 = arith.constant dense<0x7F800000> : vector<16xf32>
    %101 = vector.multi_reduction <minimumf>, %100, %cst_40 [1] : vector<16x256xf32> to vector<16xf32>
    %102 = vector.shape_cast %101 : vector<16xf32> to vector<16x1xf32>
    %103 = vector.broadcast %102 : vector<16x1xf32> to vector<16x256xf32>
    %104 = arith.cmpf ole, %100, %103 : vector<16x256xf32>
    %c256_i32_41 = arith.constant 256 : i32
    %105 = vector.broadcast %c256_i32_41 : i32 to vector<16x256xi32>
    %106 = arith.select %104, %20, %105 : vector<16x256xi1>, vector<16x256xi32>
    %cst_42 = arith.constant dense<2147483647> : vector<16xi32>
    %107 = vector.multi_reduction <minsi>, %106, %cst_42 [1] : vector<16x256xi32> to vector<16xi32>
    %108 = vector.shape_cast %107 : vector<16xi32> to vector<16x1xi32>
    %109 = vector.broadcast %108 : vector<16x1xi32> to vector<16x256xi32>
    %110 = arith.cmpi eq, %20, %109 : vector<16x256xi32>
    %cst_43 = arith.constant 0.000000e+00 : f32
    %111 = vector.broadcast %cst_43 : f32 to vector<16x256xf32>
    %112 = arith.select %110, %19, %111 : vector<16x256xi1>, vector<16x256xf32>
    %cst_44 = arith.constant dense<0.000000e+00> : vector<16xf32>
    %113 = vector.multi_reduction <add>, %112, %cst_44 [1] : vector<16x256xf32> to vector<16xf32>
    %114 = vector.shape_cast %113 : vector<16xf32> to vector<16x1xf32>
    %cst_45 = arith.constant 0x7F800000 : f32
    %115 = vector.broadcast %cst_45 : f32 to vector<16x256xf32>
    %116 = arith.select %110, %115, %100 : vector<16x256xi1>, vector<16x256xf32>
    %cst_46 = arith.constant dense<0x7F800000> : vector<16xf32>
    %117 = vector.multi_reduction <minimumf>, %116, %cst_46 [1] : vector<16x256xf32> to vector<16xf32>
    %118 = vector.shape_cast %117 : vector<16xf32> to vector<16x1xf32>
    %119 = vector.broadcast %118 : vector<16x1xf32> to vector<16x256xf32>
    %120 = arith.cmpf ole, %116, %119 : vector<16x256xf32>
    %c256_i32_47 = arith.constant 256 : i32
    %121 = vector.broadcast %c256_i32_47 : i32 to vector<16x256xi32>
    %122 = arith.select %120, %20, %121 : vector<16x256xi1>, vector<16x256xi32>
    %cst_48 = arith.constant dense<2147483647> : vector<16xi32>
    %123 = vector.multi_reduction <minsi>, %122, %cst_48 [1] : vector<16x256xi32> to vector<16xi32>
    %124 = vector.shape_cast %123 : vector<16xi32> to vector<16x1xi32>
    %125 = vector.broadcast %124 : vector<16x1xi32> to vector<16x256xi32>
    %126 = arith.cmpi eq, %20, %125 : vector<16x256xi32>
    %cst_49 = arith.constant 0.000000e+00 : f32
    %127 = vector.broadcast %cst_49 : f32 to vector<16x256xf32>
    %128 = arith.select %126, %19, %127 : vector<16x256xi1>, vector<16x256xf32>
    %cst_50 = arith.constant dense<0.000000e+00> : vector<16xf32>
    %129 = vector.multi_reduction <add>, %128, %cst_50 [1] : vector<16x256xf32> to vector<16xf32>
    %130 = vector.shape_cast %129 : vector<16xf32> to vector<16x1xf32>
    %cst_51 = arith.constant 0x7F800000 : f32
    %131 = vector.broadcast %cst_51 : f32 to vector<16x256xf32>
    %132 = arith.select %126, %131, %116 : vector<16x256xi1>, vector<16x256xf32>
    %cst_52 = arith.constant dense<0x7F800000> : vector<16xf32>
    %133 = vector.multi_reduction <minimumf>, %132, %cst_52 [1] : vector<16x256xf32> to vector<16xf32>
    %134 = vector.shape_cast %133 : vector<16xf32> to vector<16x1xf32>
    %135 = vector.broadcast %134 : vector<16x1xf32> to vector<16x256xf32>
    %136 = arith.cmpf ole, %132, %135 : vector<16x256xf32>
    %c256_i32_53 = arith.constant 256 : i32
    %137 = vector.broadcast %c256_i32_53 : i32 to vector<16x256xi32>
    %138 = arith.select %136, %20, %137 : vector<16x256xi1>, vector<16x256xi32>
    %cst_54 = arith.constant dense<2147483647> : vector<16xi32>
    %139 = vector.multi_reduction <minsi>, %138, %cst_54 [1] : vector<16x256xi32> to vector<16xi32>
    %140 = vector.shape_cast %139 : vector<16xi32> to vector<16x1xi32>
    %141 = vector.broadcast %140 : vector<16x1xi32> to vector<16x256xi32>
    %142 = arith.cmpi eq, %20, %141 : vector<16x256xi32>
    %cst_55 = arith.constant 0.000000e+00 : f32
    %143 = vector.broadcast %cst_55 : f32 to vector<16x256xf32>
    %144 = arith.select %142, %19, %143 : vector<16x256xi1>, vector<16x256xf32>
    %cst_56 = arith.constant dense<0.000000e+00> : vector<16xf32>
    %145 = vector.multi_reduction <add>, %144, %cst_56 [1] : vector<16x256xf32> to vector<16xf32>
    %146 = vector.shape_cast %145 : vector<16xf32> to vector<16x1xf32>
    %cst_57 = arith.constant 0x7F800000 : f32
    %147 = vector.broadcast %cst_57 : f32 to vector<16x256xf32>
    %148 = arith.select %142, %147, %132 : vector<16x256xi1>, vector<16x256xf32>
    %cst_58 = arith.constant dense<0x7F800000> : vector<16xf32>
    %149 = vector.multi_reduction <minimumf>, %148, %cst_58 [1] : vector<16x256xf32> to vector<16xf32>
    %150 = vector.shape_cast %149 : vector<16xf32> to vector<16x1xf32>
    %151 = vector.broadcast %150 : vector<16x1xf32> to vector<16x256xf32>
    %152 = arith.cmpf ole, %148, %151 : vector<16x256xf32>
    %c256_i32_59 = arith.constant 256 : i32
    %153 = vector.broadcast %c256_i32_59 : i32 to vector<16x256xi32>
    %154 = arith.select %152, %20, %153 : vector<16x256xi1>, vector<16x256xi32>
    %cst_60 = arith.constant dense<2147483647> : vector<16xi32>
    %155 = vector.multi_reduction <minsi>, %154, %cst_60 [1] : vector<16x256xi32> to vector<16xi32>
    %156 = vector.shape_cast %155 : vector<16xi32> to vector<16x1xi32>
    %157 = vector.broadcast %156 : vector<16x1xi32> to vector<16x256xi32>
    %158 = arith.cmpi eq, %20, %157 : vector<16x256xi32>
    %cst_61 = arith.constant 0.000000e+00 : f32
    %159 = vector.broadcast %cst_61 : f32 to vector<16x256xf32>
    %160 = arith.select %158, %19, %159 : vector<16x256xi1>, vector<16x256xf32>
    %cst_62 = arith.constant dense<0.000000e+00> : vector<16xf32>
    %161 = vector.multi_reduction <add>, %160, %cst_62 [1] : vector<16x256xf32> to vector<16xf32>
    %162 = vector.shape_cast %161 : vector<16xf32> to vector<16x1xf32>
    %cst_63 = arith.constant 0x7F800000 : f32
    %163 = vector.broadcast %cst_63 : f32 to vector<16x119xf32>
    %164 = tpu.concatenate %22, %38, %54, %70, %86, %102, %118, %134, %150, %163 in 1 : vector<16x1xf32>, vector<16x1xf32>, vector<16x1xf32>, vector<16x1xf32>, vector<16x1xf32>, vector<16x1xf32>, vector<16x1xf32>, vector<16x1xf32>, vector<16x1xf32>, vector<16x119xf32> -> vector<16x128xf32>
    %c0_64 = arith.constant 0 : index
    %c0_65 = arith.constant 0 : index
    %165 = vector.load %arg7[%c0_64, %c0_65] : memref<16x128xf32, #tpu.memory_space<vmem>>, vector<16x128xf32>
    tpu.vector_store %arg7[%c0_64, %c0_65], %164 {strides = array<i32>} : memref<16x128xf32, #tpu.memory_space<vmem>>, vector<16x128xf32>,
    %cst_66 = arith.constant 0.000000e+00 : f32
    %166 = vector.broadcast %cst_66 : f32 to vector<16x119xf32>
    %167 = tpu.concatenate %34, %50, %66, %82, %98, %114, %130, %146, %162, %166 in 1 : vector<16x1xf32>, vector<16x1xf32>, vector<16x1xf32>, vector<16x1xf32>, vector<16x1xf32>, vector<16x1xf32>, vector<16x1xf32>, vector<16x1xf32>, vector<16x1xf32>, vector<16x119xf32> -> vector<16x128xf32>
    %c0_67 = arith.constant 0 : index
    %c0_68 = arith.constant 0 : index
    %168 = vector.load %arg8[%c0_67, %c0_68] : memref<16x128xf32, #tpu.memory_space<vmem>>, vector<16x128xf32>
    tpu.vector_store %arg8[%c0_67, %c0_68], %167 {strides = array<i32>} : memref<16x128xf32, #tpu.memory_space<vmem>>, vector<16x128xf32>,
    %c0_i32_69 = arith.constant 0 : i32
    %169 = arith.cmpi eq, %arg1, %c0_i32_69 : i32
    %170 = arith.extui %169 : i1 to i32
    %c0_i32_70 = arith.constant 0 : i32
    %171 = arith.cmpi ne, %170, %c0_i32_70 : i32
    scf.if %171 {
      %172 = tpu.iota {dimensions = array<i32: 1>} : vector<16x19xi32>
      %cst_71 = arith.constant 0.000000e+00 : f32
      %173 = vector.broadcast %cst_71 : f32 to vector<16x19xf32>
      %174 = arith.fptosi %34 : vector<16x1xf32> to vector<16x1xi32>
      %175 = vector.broadcast %174 : vector<16x1xi32> to vector<16x19xi32>
      %176 = arith.cmpi eq, %172, %175 : vector<16x19xi32>
      %177 = arith.extui %176 : vector<16x19xi1> to vector<16x19xi32>
      %178 = arith.sitofp %177 : vector<16x19xi32> to vector<16x19xf32>
      %179 = arith.addf %173, %178 : vector<16x19xf32>
      %180 = arith.fptosi %50 : vector<16x1xf32> to vector<16x1xi32>
      %181 = vector.broadcast %180 : vector<16x1xi32> to vector<16x19xi32>
      %182 = arith.cmpi eq, %172, %181 : vector<16x19xi32>
      %183 = arith.extui %182 : vector<16x19xi1> to vector<16x19xi32>
      %184 = arith.sitofp %183 : vector<16x19xi32> to vector<16x19xf32>
      %185 = arith.addf %179, %184 : vector<16x19xf32>
      %186 = arith.fptosi %66 : vector<16x1xf32> to vector<16x1xi32>
      %187 = vector.broadcast %186 : vector<16x1xi32> to vector<16x19xi32>
      %188 = arith.cmpi eq, %172, %187 : vector<16x19xi32>
      %189 = arith.extui %188 : vector<16x19xi1> to vector<16x19xi32>
      %190 = arith.sitofp %189 : vector<16x19xi32> to vector<16x19xf32>
      %191 = arith.addf %185, %190 : vector<16x19xf32>
      %192 = arith.fptosi %82 : vector<16x1xf32> to vector<16x1xi32>
      %193 = vector.broadcast %192 : vector<16x1xi32> to vector<16x19xi32>
      %194 = arith.cmpi eq, %172, %193 : vector<16x19xi32>
      %195 = arith.extui %194 : vector<16x19xi1> to vector<16x19xi32>
      %196 = arith.sitofp %195 : vector<16x19xi32> to vector<16x19xf32>
      %197 = arith.addf %191, %196 : vector<16x19xf32>
      %198 = arith.fptosi %98 : vector<16x1xf32> to vector<16x1xi32>
      %199 = vector.broadcast %198 : vector<16x1xi32> to vector<16x19xi32>
      %200 = arith.cmpi eq, %172, %199 : vector<16x19xi32>
      %201 = arith.extui %200 : vector<16x19xi1> to vector<16x19xi32>
      %202 = arith.sitofp %201 : vector<16x19xi32> to vector<16x19xf32>
      %203 = arith.addf %197, %202 : vector<16x19xf32>
      %204 = arith.fptosi %114 : vector<16x1xf32> to vector<16x1xi32>
      %205 = vector.broadcast %204 : vector<16x1xi32> to vector<16x19xi32>
      %206 = arith.cmpi eq, %172, %205 : vector<16x19xi32>
      %207 = arith.extui %206 : vector<16x19xi1> to vector<16x19xi32>
      %208 = arith.sitofp %207 : vector<16x19xi32> to vector<16x19xf32>
      %209 = arith.addf %203, %208 : vector<16x19xf32>
      %210 = arith.fptosi %130 : vector<16x1xf32> to vector<16x1xi32>
      %211 = vector.broadcast %210 : vector<16x1xi32> to vector<16x19xi32>
      %212 = arith.cmpi eq, %172, %211 : vector<16x19xi32>
      %213 = arith.extui %212 : vector<16x19xi1> to vector<16x19xi32>
      %214 = arith.sitofp %213 : vector<16x19xi32> to vector<16x19xf32>
      %215 = arith.addf %209, %214 : vector<16x19xf32>
      %216 = arith.fptosi %146 : vector<16x1xf32> to vector<16x1xi32>
      %217 = vector.broadcast %216 : vector<16x1xi32> to vector<16x19xi32>
      %218 = arith.cmpi eq, %172, %217 : vector<16x19xi32>
      %219 = arith.extui %218 : vector<16x19xi1> to vector<16x19xi32>
      %220 = arith.sitofp %219 : vector<16x19xi32> to vector<16x19xf32>
      %221 = arith.addf %215, %220 : vector<16x19xf32>
      %222 = arith.fptosi %162 : vector<16x1xf32> to vector<16x1xi32>
      %223 = vector.broadcast %222 : vector<16x1xi32> to vector<16x19xi32>
      %224 = arith.cmpi eq, %172, %223 : vector<16x19xi32>
      %225 = arith.extui %224 : vector<16x19xi1> to vector<16x19xi32>
      %226 = arith.sitofp %225 : vector<16x19xi32> to vector<16x19xf32>
      %227 = arith.addf %221, %226 : vector<16x19xf32>
      %cst_72 = arith.constant 0.111111112 : f32
      %228 = vector.broadcast %cst_72 : f32 to vector<16x19xf32>
      %229 = arith.mulf %227, %228 : vector<16x19xf32>
      %cst_73 = arith.constant 0.000000e+00 : f32
      %230 = vector.broadcast %cst_73 : f32 to vector<16x19xf32>
      %231 = arith.subf %230, %229 : vector<16x19xf32>
      %cst_74 = arith.constant 9.99999997E-7 : f32
      %232 = vector.broadcast %cst_74 : f32 to vector<16x19xf32>
      %233 = arith.addf %229, %232 : vector<16x19xf32>
      %234 = math.log %233 : vector<16x19xf32>
      %235 = arith.mulf %231, %234 : vector<16x19xf32>
      %cst_75 = arith.constant 1.000000e+00 : f32
      %236 = vector.broadcast %cst_75 : f32 to vector<1x19xf32>
      %cst_76 = arith.constant dense<0.000000e+00> : vector<1x16xf32>
      %237 = tpu.matmul %236, %235, %cst_76 {dimension_numbers = #tpu.dot_dimension_numbers<[1], [1], [0], [0], [0, 0, 1, 0], [], []>} : vector<1x19xf32>, vector<16x19xf32>, vector<1x16xf32> -> vector<1x16xf32>
      %cst_77 = arith.constant 0.339623272 : f32
      %238 = vector.broadcast %cst_77 : f32 to vector<1x16xf32>
      %239 = arith.mulf %237, %238 : vector<1x16xf32>
      %c0_78 = arith.constant 0 : index
      %c0_79 = arith.constant 0 : index
      %240 = vector.load %arg6[%c0_78, %c0_79] : memref<1x16xf32, #tpu.memory_space<vmem>>, vector<1x16xf32>
      tpu.vector_store %arg6[%c0_78, %c0_79], %239 {strides = array<i32>} : memref<1x16xf32, #tpu.memory_space<vmem>>, vector<1x16xf32>,
    } else {
    }
    return
  }
  func.func @transform_0(%arg0: i32, %arg1: i32) -> (i32, i32) {
    %c0_i32 = arith.constant 0 : i32
    %c0_i32_0 = arith.constant 0 : i32
    return %arg0, %c0_i32 : i32, i32
  }
  func.func @transform_1(%arg0: i32, %arg1: i32) -> (i32, i32) {
    %c0_i32 = arith.constant 0 : i32
    %c0_i32_0 = arith.constant 0 : i32
    return %c0_i32, %arg1 : i32, i32
  }
  func.func @transform_2(%arg0: i32, %arg1: i32) -> (i32, i32) {
    %c0_i32 = arith.constant 0 : i32
    %c0_i32_0 = arith.constant 0 : i32
    %c0_i32_1 = arith.constant 0 : i32
    return %c0_i32, %c0_i32_0 : i32, i32
  }
  func.func @transform_3(%arg0: i32, %arg1: i32) -> (i32, i32) {
    %c0_i32 = arith.constant 0 : i32
    %c0_i32_0 = arith.constant 0 : i32
    %c0_i32_1 = arith.constant 0 : i32
    return %c0_i32, %c0_i32_0 : i32, i32
  }
  func.func @transform_4(%arg0: i32, %arg1: i32) -> (i32, i32) {
    %c0_i32 = arith.constant 0 : i32
    %c0_i32_0 = arith.constant 0 : i32
    return %c0_i32, %arg0 : i32, i32
  }
}

</mosaic_0001>

<bundles_post_ra>
// kernel: tpu_custom_call.1
= control target key start
LH: loop header
LB: loop body
LE: loop exit
PB: predicated region body
PF: predicated region fallthrough
CT: control target
= control target key end

     0   :  { %9 = vsyncpa [#allocation5], 0  ;;  %s1514_s0 = inlined_call_operand.hbm [shape: bf16[16,128], index: 0, kind: input, shape index: {}]   ;;  %s1515_s1 = inlined_call_operand.hbm [shape: bf16[128,128], index: 1, kind: input, shape index: {}]   ;;  %s1516_s2 = inlined_call_operand.vmem [shape: f32[1,128], index: 2, kind: input, shape index: {}]   ;;  %s1517_s3 = inlined_call_operand.vmem [shape: f32[1,128], index: 3, kind: input, shape index: {}]   ;;  %s1518_s4 = inlined_call_operand.hbm [shape: f32[1,16], index: 4, kind: output, shape index: {}]  }
   0x1   :  { %10 = vsyncpa [#allocation8], 0 }
   0x2   :  { %11 = vsyncpa [#allocation6], 0  ;;  %s16_s17 = sshll.u32 %s1514_s0, 4  ;;  %s1205_s18 = smov [#allocation4]   ;;  %s17_s17 = int_to_ptr.hbm [resolvable:$true] %s16_s17 }
   0x3   :  { %s18_s19 = sshll.u32 %s1205_s18, 4  ;;  %s29_s22 = sshll.u32 %s1515_s1, 4  ;;  %s19_s19 = int_to_ptr.vmem [resolvable:$true] %s18_s19  ;;  %s30_s22 = int_to_ptr.hbm [resolvable:$true] %s29_s22 }
   0x4   :  { %s1206_s23 = smov 64   ;;  %s1207_s24 = smov 4  }
   0x5   :  { %24 = dma.hbm_to_vmem [thread:$0]  %s17_s17, 128, %s19_s19, [#allocation5], %s1206_s23, %s1206_s23, %s1207_s24  }
   0x6   :  { %s1208_s25 = smov [#allocation7]  }
   0x7   :  { %s31_s26 = sshll.u32 %s1208_s25, 4  ;;  %s32_s26 = int_to_ptr.vmem [resolvable:$true] %s31_s26 }
   0x8   :  { %37 = dma.hbm_to_vmem [thread:$0]  %s30_s22, 1024, %s32_s26, [#allocation8], %s1206_s23, %s1206_s23, %s1207_s24  }
   0x9   :  { %1199 = dma.done.wait [#allocation5], 128  }
   0xa   :  { %1200 = vsyncadd [#allocation5], 4294967168 }
   0xb   :  { %1201 = dma.done.wait [#allocation8], 1024  }
   0xc   :  { %1202 = vsyncadd [#allocation8], 4294966272  ;;  %v1005_v0 = vld [vmem:[#allocation7 + $0x38] sm:$0xff]  ;;  %v1004_v1 = vld [vmem:[#allocation7 + $0x30] sm:$0xff]  ;;  %v160_v16 = vlaneseq  ;;  %s929_s5 = sshll.u32 %s1518_s4, 4  ;;  %s930_s5 = int_to_ptr.hbm [resolvable:$true] %s929_s5 }
   0xd   :  { %130 = vmatpush.bf16.msra.mxu0 %v1005_v0  ;;  %v1003_v2 = vld [vmem:[#allocation7 + $0x28] sm:$0xff]  ;;  %v1002_v3 = vld [vmem:[#allocation7 + $0x20] sm:$0xff]  ;;  %v1001_v4 = vld [vmem:[#allocation7 + $0x18] sm:$0xff] }
   0xe   :  { %v1000_v5 = vld [vmem:[#allocation7 + $0x10] sm:$0xff]  ;;  %v999_v6 = vld [vmem:[#allocation7 + $0x8] sm:$0xff]  ;;  %v998_v7 = vld [vmem:[#allocation7] sm:$0xff]  ;;  %v1246_v17 = vand.u32 127, %v160_v16 }
   0xf   :  { %v997_v8 = vld [vmem:[#allocation4] sm:$0xff] }
  0x10   :  { %v1121_v11 = vld [vmem:[%s1516_s2] ss:$0 sm:$0xff]  ;;  %v1249_v18 = vadd.s32 128, %v1246_v17 }
  0x11   :  { %131 = vmatpush.bf16.msra.mxu0 %v1004_v1 }
  0x15   :  { %132 = vmatpush.bf16.msra.mxu0 %v1003_v2 }
  0x19   :  { %133 = vmatpush.bf16.msra.mxu0 %v1002_v3 }
  0x1d   :  { %134 = vmatpush.bf16.msra.mxu0 %v1001_v4 }
  0x21   :  { %135 = vmatpush.bf16.msra.mxu0 %v1000_v5 }
  0x25   :  { %136 = vmatpush.bf16.msra.mxu0 %v999_v6 }
  0x29   :  { %137 = vmatpush.bf16.msra.mxu0 %v998_v7 }
  0x2c   :  { %138 = vmatmul.bf16.vlgmr.msra.gmra.mxu0 %v997_v8 }
  0xa9   :  { %v139_v9 = vpop.f32.mrf.mxu0 }
  0xaa   :  { %v146_v14 = vmul.f32 2.0, %v139_v9 }
  0xac   :  { %v151_v15 = vsub.f32 %v1121_v11, %v146_v14 }
  0xb1   :  { %v141_v10 = vpop.f32.mrf.mxu0 }
  0xb2   :  { %v147_v12 = vmul.f32 2.0, %v141_v10 }
  0xb4   :  { %v152_v13 = vsub.f32 %v1121_v11, %v147_v12 }
  0xb6   :  { %167 = vmin.xlane.f32.xlu0 %v152_v13 }
  0xbe   :  { %164 = vmin.xlane.f32.xlu0 %v151_v15 }
 0x129   :  { %v168_v19 = vpop.xlane.xlu0 %167 }
 0x12a   :  { %vm1007_vm0 = vcmp.ge.f32.partialorder %v168_v19, inf  ;;  %vm172_vm1 = vcmp.le.f32.partialorder %v152_v13, %v168_v19 }
 0x12b   :  { %v175_v20 = vsel %vm1007_vm0, %v1246_v17, 256  ;;  %v176_v21 = vsel %vm172_vm1, %v1249_v18, 256 }
 0x12c   :  { %vm193_vm2 = vcmp.lt.s32.totalorder %v175_v20, %v176_v21 }
 0x12d   :  { %v194_v22 = vsel %vm193_vm2, %v175_v20, %v176_v21 }
 0x12e   :  { %v196_v23 = vshra.s32 %v194_v22, 16  ;;  %v195_v31 = vand.u32 65535, %v194_v22 }
 0x130   :  { %v198_v24 = vcvt.s32.f32 %v196_v23  ;;  %v197_v33 = vcvt.s32.f32 %v195_v31 }
 0x131   :  { %v165_v25 = vpop.xlane.xlu0 %164 }
 0x132   :  { %vm1006_vm3 = vcmp.ge.f32.partialorder %v165_v25, inf  ;;  %vm170_vm4 = vcmp.le.f32.partialorder %v151_v15, %v165_v25  ;;  %199 = vmin.xlane.f32.xlu1 %v198_v24 }
 0x133   :  { %v173_v26 = vsel %vm1006_vm3, %v1246_v17, 256  ;;  %v174_v27 = vsel %vm170_vm4, %v1249_v18, 256 }
 0x134   :  { %vm177_vm5 = vcmp.lt.s32.totalorder %v173_v26, %v174_v27 }
 0x135   :  { %v178_v28 = vsel %vm177_vm5, %v173_v26, %v174_v27 }
 0x136   :  { %v180_v29 = vshra.s32 %v178_v28, 16  ;;  %v179_v35 = vand.u32 65535, %v178_v28 }
 0x138   :  { %v182_v30 = vcvt.s32.f32 %v180_v29  ;;  %v181_v37 = vcvt.s32.f32 %v179_v35 }
 0x13a   :  { %183 = vmin.xlane.f32.xlu1 %v182_v30 }
 0x1a5   :  { %v200_v32 = vpop.xlane.xlu1 %199 }
 0x1a6   :  { %vm201_vm6 = vcmp.eq.f32.partialorder %v198_v24, %v200_v32  ;;  %v206_v39 = vcvt.f32.s32 %v200_v32 }
 0x1a7   :  { %v202_v34 = vsel %vm201_vm6, %v197_v33, inf }
 0x1a8   :  { %203 = vmin.xlane.f32.xlu2 %v202_v34  ;;  %v207_v41 = vshll.u32 %v206_v39, 16 }
 0x1ad   :  { %v184_v36 = vpop.xlane.xlu1 %183 }
 0x1ae   :  { %vm185_vm7 = vcmp.eq.f32.partialorder %v182_v30, %v184_v36  ;;  %v190_v44 = vcvt.f32.s32 %v184_v36 }
 0x1af   :  { %v186_v38 = vsel %vm185_vm7, %v181_v37, inf }
 0x1b0   :  { %187 = vmin.xlane.f32.xlu2 %v186_v38  ;;  %v191_v47 = vshll.u32 %v190_v44, 16 }
 0x21b   :  { %v204_v40 = vpop.xlane.xlu2 %203 }
 0x21c   :  { %v205_v42 = vcvt.f32.s32 %v204_v40 }
 0x21e   :  { %v1255_v43 = vadd.s32 %v207_v41, %v205_v42 }
 0x220   :  { %vm212_vm8 = vcmp.eq.s32.totalorder %v1249_v18, %v1255_v43 }
 0x221   :  { %v226_v45 = vsel %vm212_vm8, inf, %v152_v13 }
 0x222   :  { %231 = vmin.xlane.f32.xlu0 %v226_v45 }
 0x223   :  { %v188_v46 = vpop.xlane.xlu2 %187 }
 0x224   :  { %v189_v48 = vcvt.f32.s32 %v188_v46 }
 0x226   :  { %v1262_v49 = vadd.s32 %v191_v47, %v189_v48 }
 0x228   :  { %vm210_vm9 = vcmp.eq.s32.totalorder %v1249_v18, %v1262_v49 }
 0x229   :  { %v224_v50 = vsel %vm210_vm9, inf, %v151_v15 }
 0x22a   :  { %228 = vmin.xlane.f32.xlu1 %v224_v50 }
 0x295   :  { %v232_v51 = vpop.xlane.xlu0 %231 }
 0x296   :  { %vm1009_vm10 = vcmp.ge.f32.partialorder %v232_v51, inf  ;;  %vm236_vm11 = vcmp.le.f32.partialorder %v226_v45, %v232_v51 }
 0x297   :  { %v239_v52 = vsel %vm1009_vm10, %v1246_v17, 256  ;;  %v240_v53 = vsel %vm236_vm11, %v1249_v18, 256 }
 0x298   :  { %vm257_vm12 = vcmp.lt.s32.totalorder %v239_v52, %v240_v53 }
 0x299   :  { %v258_v54 = vsel %vm257_vm12, %v239_v52, %v240_v53 }
 0x29a   :  { %v260_v55 = vshra.s32 %v258_v54, 16  ;;  %v259_v63 = vand.u32 65535, %v258_v54 }
 0x29c   :  { %v262_v56 = vcvt.s32.f32 %v260_v55  ;;  %v261_v1 = vcvt.s32.f32 %v259_v63 }
 0x29d   :  { %v229_v57 = vpop.xlane.xlu1 %228 }
 0x29e   :  { %vm1008_vm13 = vcmp.ge.f32.partialorder %v229_v57, inf  ;;  %vm234_vm14 = vcmp.le.f32.partialorder %v224_v50, %v229_v57  ;;  %263 = vmin.xlane.f32.xlu2 %v262_v56 }
 0x29f   :  { %v237_v58 = vsel %vm1008_vm13, %v1246_v17, 256  ;;  %v238_v59 = vsel %vm234_vm14, %v1249_v18, 256 }
 0x2a0   :  { %vm241_vm15 = vcmp.lt.s32.totalorder %v237_v58, %v238_v59 }
 0x2a1   :  { %v242_v60 = vsel %vm241_vm15, %v237_v58, %v238_v59 }
 0x2a2   :  { %v244_v61 = vshra.s32 %v242_v60, 16  ;;  %v243_v3 = vand.u32 65535, %v242_v60 }
 0x2a4   :  { %v246_v62 = vcvt.s32.f32 %v244_v61  ;;  %v245_v5 = vcvt.s32.f32 %v243_v3 }
 0x2a6   :  { %247 = vmin.xlane.f32.xlu0 %v246_v62 }
 0x311   :  { %v264_v0 = vpop.xlane.xlu2 %263 }
 0x312   :  { %vm265_vm0 = vcmp.eq.f32.partialorder %v262_v56, %v264_v0  ;;  %v270_v7 = vcvt.f32.s32 %v264_v0 }
 0x313   :  { %v266_v2 = vsel %vm265_vm0, %v261_v1, inf }
 0x314   :  { %267 = vmin.xlane.f32.xlu1 %v266_v2  ;;  %v271_v9 = vshll.u32 %v270_v7, 16 }
 0x319   :  { %v248_v4 = vpop.xlane.xlu0 %247 }
 0x31a   :  { %vm249_vm1 = vcmp.eq.f32.partialorder %v246_v62, %v248_v4  ;;  %v254_v12 = vcvt.f32.s32 %v248_v4 }
 0x31b   :  { %v250_v6 = vsel %vm249_vm1, %v245_v5, inf }
 0x31c   :  { %251 = vmin.xlane.f32.xlu2 %v250_v6  ;;  %v255_v15 = vshll.u32 %v254_v12, 16 }
 0x387   :  { %v268_v8 = vpop.xlane.xlu1 %267 }
 0x388   :  { %v269_v10 = vcvt.f32.s32 %v268_v8 }
 0x38a   :  { %v1273_v11 = vadd.s32 %v271_v9, %v269_v10 }
 0x38c   :  { %vm276_vm2 = vcmp.eq.s32.totalorder %v1249_v18, %v1273_v11 }
 0x38d   :  { %v290_v13 = vsel %vm276_vm2, inf, %v226_v45 }
 0x38e   :  { %295 = vmin.xlane.f32.xlu0 %v290_v13 }
 0x38f   :  { %v252_v14 = vpop.xlane.xlu2 %251 }
 0x390   :  { %v253_v16 = vcvt.f32.s32 %v252_v14 }
 0x392   :  { %v1280_v19 = vadd.s32 %v255_v15, %v253_v16 }
 0x394   :  { %vm274_vm3 = vcmp.eq.s32.totalorder %v1249_v18, %v1280_v19 }
 0x395   :  { %v288_v20 = vsel %vm274_vm3, inf, %v224_v50 }
 0x396   :  { %292 = vmin.xlane.f32.xlu1 %v288_v20 }
 0x401   :  { %v296_v21 = vpop.xlane.xlu0 %295 }
 0x402   :  { %vm1011_vm4 = vcmp.ge.f32.partialorder %v296_v21, inf  ;;  %vm300_vm5 = vcmp.le.f32.partialorder %v290_v13, %v296_v21 }
 0x403   :  { %v303_v22 = vsel %vm1011_vm4, %v1246_v17, 256  ;;  %v304_v23 = vsel %vm300_vm5, %v1249_v18, 256 }
 0x404   :  { %vm321_vm6 = vcmp.lt.s32.totalorder %v303_v22, %v304_v23 }
 0x405   :  { %v322_v24 = vsel %vm321_vm6, %v303_v22, %v304_v23 }
 0x406   :  { %v324_v25 = vshra.s32 %v322_v24, 16  ;;  %v323_v33 = vand.u32 65535, %v322_v24 }
 0x408   :  { %v326_v26 = vcvt.s32.f32 %v324_v25  ;;  %v325_v35 = vcvt.s32.f32 %v323_v33 }
 0x409   :  { %v293_v27 = vpop.xlane.xlu1 %292 }
 0x40a   :  { %vm1010_vm7 = vcmp.ge.f32.partialorder %v293_v27, inf  ;;  %vm298_vm10 = vcmp.le.f32.partialorder %v288_v20, %v293_v27  ;;  %327 = vmin.xlane.f32.xlu2 %v326_v26 }
 0x40b   :  { %v301_v28 = vsel %vm1010_vm7, %v1246_v17, 256  ;;  %v302_v29 = vsel %vm298_vm10, %v1249_v18, 256 }
 0x40c   :  { %vm305_vm11 = vcmp.lt.s32.totalorder %v301_v28, %v302_v29 }
 0x40d   :  { %v306_v30 = vsel %vm305_vm11, %v301_v28, %v302_v29 }
 0x40e   :  { %v308_v31 = vshra.s32 %v306_v30, 16  ;;  %v307_v37 = vand.u32 65535, %v306_v30 }
 0x410   :  { %v310_v32 = vcvt.s32.f32 %v308_v31  ;;  %v309_v39 = vcvt.s32.f32 %v307_v37 }
 0x412   :  { %311 = vmin.xlane.f32.xlu0 %v310_v32 }
 0x47d   :  { %v328_v34 = vpop.xlane.xlu2 %327 }
 0x47e   :  { %vm329_vm12 = vcmp.eq.f32.partialorder %v326_v26, %v328_v34  ;;  %v334_v41 = vcvt.f32.s32 %v328_v34 }
 0x47f   :  { %v330_v36 = vsel %vm329_vm12, %v325_v35, inf }
 0x480   :  { %331 = vmin.xlane.f32.xlu1 %v330_v36  ;;  %v335_v44 = vshll.u32 %v334_v41, 16 }
 0x485   :  { %v312_v38 = vpop.xlane.xlu0 %311 }
 0x486   :  { %vm313_vm13 = vcmp.eq.f32.partialorder %v310_v32, %v312_v38  ;;  %v318_v47 = vcvt.f32.s32 %v312_v38 }
 0x487   :  { %v314_v40 = vsel %vm313_vm13, %v309_v39, inf }
 0x488   :  { %315 = vmin.xlane.f32.xlu2 %v314_v40  ;;  %v319_v51 = vshll.u32 %v318_v47, 16 }
 0x4f3   :  { %v332_v42 = vpop.xlane.xlu1 %331 }
 0x4f4   :  { %v333_v45 = vcvt.f32.s32 %v332_v42 }
 0x4f6   :  { %v1291_v46 = vadd.s32 %v335_v44, %v333_v45 }
 0x4f8   :  { %vm340_vm14 = vcmp.eq.s32.totalorder %v1249_v18, %v1291_v46 }
 0x4f9   :  { %v354_v48 = vsel %vm340_vm14, inf, %v290_v13 }
 0x4fa   :  { %359 = vmin.xlane.f32.xlu0 %v354_v48 }
 0x4fb   :  { %v316_v50 = vpop.xlane.xlu2 %315 }
 0x4fc   :  { %v317_v52 = vcvt.f32.s32 %v316_v50 }
 0x4fe   :  { %v1298_v53 = vadd.s32 %v319_v51, %v317_v52 }
 0x500   :  { %vm338_vm15 = vcmp.eq.s32.totalorder %v1249_v18, %v1298_v53 }
 0x501   :  { %v352_v54 = vsel %vm338_vm15, inf, %v288_v20 }
 0x502   :  { %356 = vmin.xlane.f32.xlu1 %v352_v54 }
 0x56d   :  { %v360_v55 = vpop.xlane.xlu0 %359 }
 0x56e   :  { %vm1013_vm0 = vcmp.ge.f32.partialorder %v360_v55, inf  ;;  %vm364_vm1 = vcmp.le.f32.partialorder %v354_v48, %v360_v55 }
 0x56f   :  { %v367_v56 = vsel %vm1013_vm0, %v1246_v17, 256  ;;  %v368_v57 = vsel %vm364_vm1, %v1249_v18, 256 }
 0x570   :  { %vm385_vm4 = vcmp.lt.s32.totalorder %v367_v56, %v368_v57 }
 0x571   :  { %v386_v58 = vsel %vm385_vm4, %v367_v56, %v368_v57 }
 0x572   :  { %v388_v59 = vshra.s32 %v386_v58, 16  ;;  %v387_v3 = vand.u32 65535, %v386_v58 }
 0x574   :  { %v390_v60 = vcvt.s32.f32 %v388_v59  ;;  %v389_v5 = vcvt.s32.f32 %v387_v3 }
 0x575   :  { %v357_v61 = vpop.xlane.xlu1 %356 }
 0x576   :  { %vm1012_vm5 = vcmp.ge.f32.partialorder %v357_v61, inf  ;;  %vm362_vm6 = vcmp.le.f32.partialorder %v352_v54, %v357_v61  ;;  %391 = vmin.xlane.f32.xlu2 %v390_v60 }
 0x577   :  { %v365_v62 = vsel %vm1012_vm5, %v1246_v17, 256  ;;  %v366_v63 = vsel %vm362_vm6, %v1249_v18, 256 }
 0x578   :  { %vm369_vm7 = vcmp.lt.s32.totalorder %v365_v62, %v366_v63 }
 0x579   :  { %v370_v0 = vsel %vm369_vm7, %v365_v62, %v366_v63 }
 0x57a   :  { %v372_v1 = vshra.s32 %v370_v0, 16  ;;  %v371_v7 = vand.u32 65535, %v370_v0 }
 0x57c   :  { %v374_v2 = vcvt.s32.f32 %v372_v1  ;;  %v373_v9 = vcvt.s32.f32 %v371_v7 }
 0x57e   :  { %375 = vmin.xlane.f32.xlu0 %v374_v2 }
 0x5e9   :  { %v392_v4 = vpop.xlane.xlu2 %391 }
 0x5ea   :  { %vm393_vm10 = vcmp.eq.f32.partialorder %v390_v60, %v392_v4  ;;  %v398_v12 = vcvt.f32.s32 %v392_v4 }
 0x5eb   :  { %v394_v6 = vsel %vm393_vm10, %v389_v5, inf }
 0x5ec   :  { %395 = vmin.xlane.f32.xlu1 %v394_v6  ;;  %v399_v14 = vshll.u32 %v398_v12, 16 }
 0x5f1   :  { %v376_v8 = vpop.xlane.xlu0 %375 }
 0x5f2   :  { %vm377_vm11 = vcmp.eq.f32.partialorder %v374_v2, %v376_v8  ;;  %v382_v20 = vcvt.f32.s32 %v376_v8 }
 0x5f3   :  { %v378_v10 = vsel %vm377_vm11, %v373_v9, inf }
 0x5f4   :  { %379 = vmin.xlane.f32.xlu2 %v378_v10  ;;  %v383_v23 = vshll.u32 %v382_v20, 16 }
 0x65f   :  { %v396_v13 = vpop.xlane.xlu1 %395 }
 0x660   :  { %v397_v15 = vcvt.f32.s32 %v396_v13 }
 0x662   :  { %v1309_v16 = vadd.s32 %v399_v14, %v397_v15 }
 0x664   :  { %vm404_vm12 = vcmp.eq.s32.totalorder %v1249_v18, %v1309_v16 }
 0x665   :  { %v418_v21 = vsel %vm404_vm12, inf, %v354_v48 }
 0x666   :  { %423 = vmin.xlane.f32.xlu0 %v418_v21 }
 0x667   :  { %v380_v22 = vpop.xlane.xlu2 %379 }
 0x668   :  { %v381_v24 = vcvt.f32.s32 %v380_v22 }
 0x66a   :  { %v1316_v25 = vadd.s32 %v383_v23, %v381_v24 }
 0x66c   :  { %vm1519_vm13 = vcmp.eq.s32.totalorder %v1249_v18, %v1316_v25 }
 0x66d   :  { %v416_v26 = vsel %vm1519_vm13, inf, %v352_v54 }
 0x66e   :  { %420 = vmin.xlane.f32.xlu1 %v416_v26 }
 0x6d9   :  { %v424_v27 = vpop.xlane.xlu0 %423 }
 0x6da   :  { %vm1015_vm0 = vcmp.ge.f32.partialorder %v424_v27, inf  ;;  %vm428_vm1 = vcmp.le.f32.partialorder %v418_v21, %v424_v27 }
 0x6db   :  { %v431_v28 = vsel %vm1015_vm0, %v1246_v17, 256  ;;  %v432_v29 = vsel %vm428_vm1, %v1249_v18, 256 }
 0x6dc   :  { %vm449_vm4 = vcmp.lt.s32.totalorder %v431_v28, %v432_v29 }
 0x6dd   :  { %v450_v30 = vsel %vm449_vm4, %v431_v28, %v432_v29 }
 0x6de   :  { %v452_v31 = vshra.s32 %v450_v30, 16  ;;  %v451_v39 = vand.u32 65535, %v450_v30 }
 0x6e0   :  { %v454_v32 = vcvt.s32.f32 %v452_v31  ;;  %v453_v41 = vcvt.s32.f32 %v451_v39 }
 0x6e1   :  { %v421_v33 = vpop.xlane.xlu1 %420 }
 0x6e2   :  { %vm1014_vm5 = vcmp.ge.f32.partialorder %v421_v33, inf  ;;  %vm426_vm6 = vcmp.le.f32.partialorder %v416_v26, %v421_v33  ;;  %455 = vmin.xlane.f32.xlu2 %v454_v32 }
 0x6e3   :  { %v429_v34 = vsel %vm1014_vm5, %v1246_v17, 256  ;;  %v430_v35 = vsel %vm426_vm6, %v1249_v18, 256 }
 0x6e4   :  { %vm433_vm7 = vcmp.lt.s32.totalorder %v429_v34, %v430_v35 }
 0x6e5   :  { %v434_v36 = vsel %vm433_vm7, %v429_v34, %v430_v35 }
 0x6e6   :  { %v436_v37 = vshra.s32 %v434_v36, 16  ;;  %v435_v44 = vand.u32 65535, %v434_v36 }
 0x6e8   :  { %v438_v38 = vcvt.s32.f32 %v436_v37  ;;  %v437_v47 = vcvt.s32.f32 %v435_v44 }
 0x6ea   :  { %439 = vmin.xlane.f32.xlu0 %v438_v38 }
 0x755   :  { %v456_v40 = vpop.xlane.xlu2 %455 }
 0x756   :  { %vm457_vm10 = vcmp.eq.f32.partialorder %v454_v32, %v456_v40  ;;  %v462_v50 = vcvt.f32.s32 %v456_v40 }
 0x757   :  { %v458_v42 = vsel %vm457_vm10, %v453_v41, inf }
 0x758   :  { %459 = vmin.xlane.f32.xlu1 %v458_v42  ;;  %v463_v52 = vshll.u32 %v462_v50, 16 }
 0x75d   :  { %v440_v45 = vpop.xlane.xlu0 %439 }
 0x75e   :  { %vm441_vm11 = vcmp.eq.f32.partialorder %v438_v38, %v440_v45  ;;  %v446_v56 = vcvt.f32.s32 %v440_v45 }
 0x75f   :  { %v442_v48 = vsel %vm441_vm11, %v437_v47, inf }
 0x760   :  { %443 = vmin.xlane.f32.xlu2 %v442_v48  ;;  %v447_v59 = vshll.u32 %v446_v56, 16 }
 0x7cb   :  { %v460_v51 = vpop.xlane.xlu1 %459 }
 0x7cc   :  { %v461_v54 = vcvt.f32.s32 %v460_v51 }
 0x7ce   :  { %v1327_v55 = vadd.s32 %v463_v52, %v461_v54 }
 0x7d0   :  { %vm468_vm0 = vcmp.eq.s32.totalorder %v1249_v18, %v1327_v55 }
 0x7d1   :  { %v482_v57 = vsel %vm468_vm0, inf, %v418_v21 }
 0x7d2   :  { %487 = vmin.xlane.f32.xlu0 %v482_v57 }
 0x7d3   :  { %v444_v58 = vpop.xlane.xlu2 %443 }
 0x7d4   :  { %v445_v60 = vcvt.f32.s32 %v444_v58 }
 0x7d6   :  { %v1334_v61 = vadd.s32 %v447_v59, %v445_v60 }
 0x7d8   :  { %vm1520_vm1 = vcmp.eq.s32.totalorder %v1249_v18, %v1334_v61 }
 0x7d9   :  { %v480_v62 = vsel %vm1520_vm1, inf, %v416_v26 }
 0x7da   :  { %484 = vmin.xlane.f32.xlu1 %v480_v62 }
 0x845   :  { %v488_v63 = vpop.xlane.xlu0 %487 }
 0x846   :  { %vm1017_vm4 = vcmp.ge.f32.partialorder %v488_v63, inf  ;;  %vm492_vm5 = vcmp.le.f32.partialorder %v482_v57, %v488_v63 }
 0x847   :  { %v495_v0 = vsel %vm1017_vm4, %v1246_v17, 256  ;;  %v496_v1 = vsel %vm492_vm5, %v1249_v18, 256 }
 0x848   :  { %vm513_vm6 = vcmp.lt.s32.totalorder %v495_v0, %v496_v1 }
 0x849   :  { %v514_v2 = vsel %vm513_vm6, %v495_v0, %v496_v1 }
 0x84a   :  { %v516_v3 = vshra.s32 %v514_v2, 16  ;;  %v515_v12 = vand.u32 65535, %v514_v2 }
 0x84c   :  { %v518_v4 = vcvt.s32.f32 %v516_v3  ;;  %v517_v14 = vcvt.s32.f32 %v515_v12 }
 0x84d   :  { %v485_v5 = vpop.xlane.xlu1 %484 }
 0x84e   :  { %vm1016_vm7 = vcmp.ge.f32.partialorder %v485_v5, inf  ;;  %vm490_vm10 = vcmp.le.f32.partialorder %v480_v62, %v485_v5  ;;  %519 = vmin.xlane.f32.xlu2 %v518_v4 }
 0x84f   :  { %v493_v6 = vsel %vm1016_vm7, %v1246_v17, 256  ;;  %v494_v7 = vsel %vm490_vm10, %v1249_v18, 256 }
 0x850   :  { %vm497_vm11 = vcmp.lt.s32.totalorder %v493_v6, %v494_v7 }
 0x851   :  { %v498_v8 = vsel %vm497_vm11, %v493_v6, %v494_v7 }
 0x852   :  { %v500_v9 = vshra.s32 %v498_v8, 16  ;;  %v499_v20 = vand.u32 65535, %v498_v8 }
 0x854   :  { %v502_v10 = vcvt.s32.f32 %v500_v9  ;;  %v501_v22 = vcvt.s32.f32 %v499_v20 }
 0x856   :  { %503 = vmin.xlane.f32.xlu0 %v502_v10 }
 0x8c1   :  { %v520_v13 = vpop.xlane.xlu2 %519 }
 0x8c2   :  { %vm521_vm4 = vcmp.eq.f32.partialorder %v518_v4, %v520_v13  ;;  %v526_v24 = vcvt.f32.s32 %v520_v13 }
 0x8c3   :  { %v522_v15 = vsel %vm521_vm4, %v517_v14, inf }
 0x8c4   :  { %523 = vmin.xlane.f32.xlu1 %v522_v15  ;;  %v527_v27 = vshll.u32 %v526_v24, 16 }
 0x8c9   :  { %v504_v21 = vpop.xlane.xlu0 %503 }
 0x8ca   :  { %vm505_vm5 = vcmp.eq.f32.partialorder %v502_v10, %v504_v21  ;;  %v510_v30 = vcvt.f32.s32 %v504_v21 }
 0x8cb   :  { %v506_v23 = vsel %vm505_vm5, %v501_v22, inf }
 0x8cc   :  { %507 = vmin.xlane.f32.xlu2 %v506_v23  ;;  %v511_v33 = vshll.u32 %v510_v30, 16 }
 0x937   :  { %v524_v26 = vpop.xlane.xlu1 %523 }
 0x938   :  { %v525_v28 = vcvt.f32.s32 %v524_v26 }
 0x93a   :  { %v1345_v29 = vadd.s32 %v527_v27, %v525_v28 }
 0x93c   :  { %vm532_vm6 = vcmp.eq.s32.totalorder %v1249_v18, %v1345_v29 }
 0x93d   :  { %v546_v31 = vsel %vm532_vm6, inf, %v482_v57 }
 0x93e   :  { %551 = vmin.xlane.f32.xlu0 %v546_v31 }
 0x93f   :  { %v508_v32 = vpop.xlane.xlu2 %507 }
 0x940   :  { %v509_v34 = vcvt.f32.s32 %v508_v32 }
 0x942   :  { %v1352_v35 = vadd.s32 %v511_v33, %v509_v34 }
 0x944   :  { %vm530_vm7 = vcmp.eq.s32.totalorder %v1249_v18, %v1352_v35 }
 0x945   :  { %v544_v36 = vsel %vm530_vm7, inf, %v480_v62 }
 0x946   :  { %548 = vmin.xlane.f32.xlu1 %v544_v36 }
 0x9b1   :  { %v552_v37 = vpop.xlane.xlu0 %551 }
 0x9b2   :  { %vm1019_vm10 = vcmp.ge.f32.partialorder %v552_v37, inf  ;;  %vm556_vm11 = vcmp.le.f32.partialorder %v546_v31, %v552_v37 }
 0x9b3   :  { %v559_v38 = vsel %vm1019_vm10, %v1246_v17, 256  ;;  %v560_v39 = vsel %vm556_vm11, %v1249_v18, 256 }
 0x9b4   :  { %vm577_vm4 = vcmp.lt.s32.totalorder %v559_v38, %v560_v39 }
 0x9b5   :  { %v578_v40 = vsel %vm577_vm4, %v559_v38, %v560_v39 }
 0x9b6   :  { %v580_v41 = vshra.s32 %v578_v40, 16  ;;  %v579_v52 = vand.u32 65535, %v578_v40 }
 0x9b8   :  { %v582_v42 = vcvt.s32.f32 %v580_v41  ;;  %v581_v56 = vcvt.s32.f32 %v579_v52 }
 0x9b9   :  { %v549_v44 = vpop.xlane.xlu1 %548 }
 0x9ba   :  { %vm1018_vm5 = vcmp.ge.f32.partialorder %v549_v44, inf  ;;  %vm554_vm13 = vcmp.le.f32.partialorder %v544_v36, %v549_v44  ;;  %583 = vmin.xlane.f32.xlu2 %v582_v42 }
 0x9bb   :  { %v557_v45 = vsel %vm1018_vm5, %v1246_v17, 256  ;;  %v558_v47 = vsel %vm554_vm13, %v1249_v18, 256 }
 0x9bc   :  { %vm561_vm1 = vcmp.lt.s32.totalorder %v557_v45, %v558_v47 }
 0x9bd   :  { %v562_v48 = vsel %vm561_vm1, %v557_v45, %v558_v47 }
 0x9be   :  { %v564_v50 = vshra.s32 %v562_v48, 16  ;;  %v563_v58 = vand.u32 65535, %v562_v48 }
 0x9c0   :  { %v566_v51 = vcvt.s32.f32 %v564_v50  ;;  %v565_v60 = vcvt.s32.f32 %v563_v58 }
 0x9c2   :  { %567 = vmin.xlane.f32.xlu0 %v566_v51 }
 0xa2d   :  { %v584_v54 = vpop.xlane.xlu2 %583 }
 0xa2e   :  { %vm585_vm10 = vcmp.eq.f32.partialorder %v582_v42, %v584_v54  ;;  %v590_v63 = vcvt.f32.s32 %v584_v54 }
 0xa2f   :  { %v586_v57 = vsel %vm585_vm10, %v581_v56, inf }
 0xa30   :  { %587 = vmin.xlane.f32.xlu1 %v586_v57  ;;  %v591_v1 = vshll.u32 %v590_v63, 16 }
 0xa35   :  { %v568_v59 = vpop.xlane.xlu0 %567 }
 0xa36   :  { %vm569_vm11 = vcmp.eq.f32.partialorder %v566_v51, %v568_v59  ;;  %v574_v4 = vcvt.f32.s32 %v568_v59 }
 0xa37   :  { %v570_v62 = vsel %vm569_vm11, %v565_v60, inf }
 0xa38   :  { %571 = vmin.xlane.f32.xlu2 %v570_v62  ;;  %v575_v7 = vshll.u32 %v574_v4, 16 }
 0xaa3   :  { %v588_v0 = vpop.xlane.xlu1 %587 }
 0xaa4   :  { %v589_v2 = vcvt.f32.s32 %v588_v0 }
 0xaa6   :  { %v1363_v3 = vadd.s32 %v591_v1, %v589_v2 }
 0xaa8   :  { %vm1521_vm13 = vcmp.eq.s32.totalorder %v1249_v18, %v1363_v3 }
 0xaa9   :  { %v610_v5 = vsel %vm1521_vm13, inf, %v546_v31 }
 0xaaa   :  { %615 = vmin.xlane.f32.xlu0 %v610_v5 }
 0xaab   :  { %v572_v6 = vpop.xlane.xlu2 %571 }
 0xaac   :  { %v573_v8 = vcvt.f32.s32 %v572_v6  ;;  %v1122_v6 = vld [vmem:[%s1517_s3] ss:$0 sm:$0xff]  ;;  %s1211_s3 = smov [#allocation9]  }
 0xaad   :  { %v534_v43 = vsel %vm530_vm7, %v1122_v6, 0.0  ;;  %v280_v29 = vsel %vm276_vm2, %v1122_v6, 0.0  ;;  %v278_v35 = vsel %vm274_vm3, %v1122_v6, 0.0  ;;  %v408_v11 = vsel %vm404_vm12, %v1122_v6, 0.0  ;;  %s927_s28 = sshll.u32 %s1211_s3, 4  ;;  %s928_s28 = int_to_ptr.vmem [resolvable:$true] %s927_s28 }
 0xaae   :  { %v1370_v9 = vadd.s32 %v575_v7, %v573_v8  ;;  %v216_v7 = vsel %vm212_vm8, %v1122_v6, 0.0  ;;  %v214_v8 = vsel %vm210_vm9, %v1122_v6, 0.0  ;;  %vm1525_vm2 = vcmp.eq.s32.totalorder %v1249_v18, %v1334_v61 }
 0xaaf   :  { %v470_v19 = vsel %vm1525_vm2, %v1122_v6, 0.0  ;;  %vm1526_vm3 = vcmp.eq.s32.totalorder %v1249_v18, %v1316_v25 }
 0xab0   :  { %vm1522_vm1 = vcmp.eq.s32.totalorder %v1249_v18, %v1370_v9  ;;  %v406_v46 = vsel %vm1526_vm3, %v1122_v6, 0.0 }
 0xab1   :  { %v608_v10 = vsel %vm1522_vm1, inf, %v544_v36 }
 0xab2   :  { %612 = vmin.xlane.f32.xlu1 %v608_v10 }
 0xb1d   :  { %v616_v12 = vpop.xlane.xlu0 %615 }
 0xb1e   :  { %vm1021_vm4 = vcmp.ge.f32.partialorder %v616_v12, inf  ;;  %vm620_vm5 = vcmp.le.f32.partialorder %v610_v5, %v616_v12  ;;  %v536_v12 = vsel %vm532_vm6, %v1122_v6, 0.0 }
 0xb1f   :  { %v623_v13 = vsel %vm1021_vm4, %v1246_v17, 256  ;;  %v624_v14 = vsel %vm620_vm5, %v1249_v18, 256 }
 0xb20   :  { %vm641_vm10 = vcmp.lt.s32.totalorder %v623_v13, %v624_v14 }
 0xb21   :  { %v642_v15 = vsel %vm641_vm10, %v623_v13, %v624_v14 }
 0xb22   :  { %v644_v20 = vshra.s32 %v642_v15, 16  ;;  %v643_v30 = vand.u32 65535, %v642_v15 }
 0xb24   :  { %v646_v21 = vcvt.s32.f32 %v644_v20  ;;  %v645_v32 = vcvt.s32.f32 %v643_v30 }
 0xb25   :  { %v613_v22 = vpop.xlane.xlu1 %612 }
 0xb26   :  { %vm1020_vm11 = vcmp.ge.f32.partialorder %v613_v22, inf  ;;  %vm618_vm13 = vcmp.le.f32.partialorder %v608_v10, %v613_v22  ;;  %647 = vmin.xlane.f32.xlu2 %v646_v21 }
 0xb27   :  { %v621_v23 = vsel %vm1020_vm11, %v1246_v17, 256  ;;  %v622_v24 = vsel %vm618_vm13, %v1249_v18, 256 }
 0xb28   :  { %vm625_vm1 = vcmp.lt.s32.totalorder %v621_v23, %v622_v24 }
 0xb29   :  { %v626_v26 = vsel %vm625_vm1, %v621_v23, %v622_v24  ;;  %v344_v23 = vsel %vm340_vm14, %v1122_v6, 0.0  ;;  %v472_v24 = vsel %vm468_vm0, %v1122_v6, 0.0  ;;  %vm1530_vm0 = vcmp.eq.s32.totalorder %v1249_v18, %v1370_v9 }
 0xb2a   :  { %v628_v27 = vshra.s32 %v626_v26, 16  ;;  %v627_v34 = vand.u32 65535, %v626_v26  ;;  %v598_v25 = vsel %vm1530_vm0, %v1122_v6, 0.0 }
 0xb2c   :  { %v630_v28 = vcvt.s32.f32 %v628_v27  ;;  %v629_v37 = vcvt.s32.f32 %v627_v34 }
 0xb2e   :  { %631 = vmin.xlane.f32.xlu0 %v630_v28 }
 0xb99   :  { %v648_v31 = vpop.xlane.xlu2 %647 }
 0xb9a   :  { %vm649_vm4 = vcmp.eq.f32.partialorder %v646_v21, %v648_v31  ;;  %v654_v39 = vcvt.f32.s32 %v648_v31 }
 0xb9b   :  { %v650_v33 = vsel %vm649_vm4, %v645_v32, inf }
 0xb9c   :  { %651 = vmin.xlane.f32.xlu1 %v650_v33  ;;  %v655_v41 = vshll.u32 %v654_v39, 16 }
 0xba1   :  { %v632_v36 = vpop.xlane.xlu0 %631 }
 0xba2   :  { %vm633_vm5 = vcmp.eq.f32.partialorder %v630_v28, %v632_v36  ;;  %v638_v45 = vcvt.f32.s32 %v632_v36 }
 0xba3   :  { %v634_v38 = vsel %vm633_vm5, %v629_v37, inf }
 0xba4   :  { %635 = vmin.xlane.f32.xlu2 %v634_v38  ;;  %v639_v50 = vshll.u32 %v638_v45, 16 }
 0xc0f   :  { %v652_v40 = vpop.xlane.xlu1 %651 }
 0xc10   :  { %v653_v42 = vcvt.f32.s32 %v652_v40 }
 0xc12   :  { %v1381_v44 = vadd.s32 %v655_v41, %v653_v42 }
 0xc14   :  { %vm1523_vm13 = vcmp.eq.s32.totalorder %v1249_v18, %v1381_v44  ;;  %vm1527_vm14 = vcmp.eq.s32.totalorder %v1249_v18, %v1381_v44 }
 0xc15   :  { %v674_v47 = vsel %vm1523_vm13, inf, %v610_v5  ;;  %v664_v55 = vsel %vm1527_vm14, %v1122_v6, 0.0 }
 0xc16   :  { %679 = vmin.xlane.f32.xlu0 %v674_v47 }
 0xc17   :  { %v636_v48 = vpop.xlane.xlu2 %635 }
 0xc18   :  { %v637_v51 = vcvt.f32.s32 %v636_v48 }
 0xc1a   :  { %v1388_v52 = vadd.s32 %v639_v50, %v637_v51 }
 0xc1c   :  { %vm1524_vm1 = vcmp.eq.s32.totalorder %v1249_v18, %v1388_v52  ;;  %vm1529_vm12 = vcmp.eq.s32.totalorder %v1249_v18, %v1388_v52 }
 0xc1d   :  { %v672_v54 = vsel %vm1524_vm1, inf, %v608_v10  ;;  %v342_v10 = vsel %vm338_vm15, %v1122_v6, 0.0  ;;  %vm1528_vm15 = vcmp.eq.s32.totalorder %v1249_v18, %v1363_v3  ;;  %v662_v61 = vsel %vm1529_vm12, %v1122_v6, 0.0 }
 0xc1e   :  { %676 = vmin.xlane.f32.xlu1 %v672_v54  ;;  %v600_v16 = vsel %vm1528_vm15, %v1122_v6, 0.0 }
 0xc89   :  { %v680_v56 = vpop.xlane.xlu0 %679 }
 0xc8a   :  { %vm1023_vm10 = vcmp.ge.f32.partialorder %v680_v56, inf  ;;  %vm684_vm11 = vcmp.le.f32.partialorder %v674_v47, %v680_v56 }
 0xc8b   :  { %v687_v57 = vsel %vm1023_vm10, %v1246_v17, 256  ;;  %v688_v58 = vsel %vm684_vm11, %v1249_v18, 256 }
 0xc8c   :  { %vm705_vm4 = vcmp.lt.s32.totalorder %v687_v57, %v688_v58 }
 0xc8d   :  { %v706_v59 = vsel %vm705_vm4, %v687_v57, %v688_v58 }
 0xc8e   :  { %v708_v60 = vshra.s32 %v706_v59, 16  ;;  %v707_v13 = vand.u32 65535, %v706_v59 }
 0xc90   :  { %v710_v62 = vcvt.s32.f32 %v708_v60  ;;  %v709_v49 = vcvt.s32.f32 %v707_v13 }
 0xc91   :  { %v677_v63 = vpop.xlane.xlu1 %676 }
 0xc92   :  { %vm1022_vm5 = vcmp.ge.f32.partialorder %v677_v63, inf  ;;  %vm682_vm13 = vcmp.le.f32.partialorder %v672_v54, %v677_v63  ;;  %711 = vmin.xlane.f32.xlu2 %v710_v62 }
 0xc93   :  { %v685_v0 = vsel %vm1022_vm5, %v1246_v17, 256  ;;  %v686_v1 = vsel %vm682_vm13, %v1249_v18, 256 }
 0xc94   :  { %vm689_vm1 = vcmp.lt.s32.totalorder %v685_v0, %v686_v1 }
 0xc95   :  { %v690_v2 = vsel %vm689_vm1, %v685_v0, %v686_v1 }
 0xc96   :  { %v692_v4 = vshra.s32 %v690_v2, 16  ;;  %v691_v20 = vand.u32 65535, %v690_v2 }
 0xc98   :  { %v694_v5 = vcvt.s32.f32 %v692_v4  ;;  %v693_v21 = vcvt.s32.f32 %v691_v20 }
 0xc9a   :  { %695 = vmin.xlane.f32.xlu0 %v694_v5 }
 0xca2   :  { %221 = vadd.xlane.f32.xlu0 %v216_v7 }
 0xcaa   :  { %218 = vadd.xlane.f32.xlu0 %v214_v8 }
 0xcb2   :  { %346 = vadd.xlane.f32.xlu0 %v342_v10 }
 0xcba   :  { %541 = vadd.xlane.f32.xlu0 %v536_v12 }
 0xcc2   :  { %538 = vadd.xlane.f32.xlu0 %v534_v43 }
 0xd05   :  { %v712_v14 = vpop.xlane.xlu2 %711 }
 0xd06   :  { %vm713_vm8 = vcmp.eq.f32.partialorder %v710_v62, %v712_v14  ;;  %v718_v26 = vcvt.f32.s32 %v712_v14 }
 0xd07   :  { %v714_v15 = vsel %vm713_vm8, %v709_v49, inf }
 0xd08   :  { %715 = vmin.xlane.f32.xlu1 %v714_v15  ;;  %v719_v28 = vshll.u32 %v718_v26, 16 }
 0xd0d   :  { %v696_v53 = vpop.xlane.xlu0 %695 }
 0xd0e   :  { %vm697_vm9 = vcmp.eq.f32.partialorder %v694_v5, %v696_v53  ;;  %v702_v32 = vcvt.f32.s32 %v696_v53 }
 0xd0f   :  { %v698_v22 = vsel %vm697_vm9, %v693_v21, inf }
 0xd10   :  { %285 = vadd.xlane.f32.xlu1 %v280_v29  ;;  %699 = vmin.xlane.f32.xlu2 %v698_v22  ;;  %v703_v34 = vshll.u32 %v702_v32, 16 }
 0xd15   :  { %v222_v38 = vpop.xlane.xlu0 %221 }
 0xd16   :  { %v1030_v52 = vceil.f32 %v222_v38  ;;  %v1031_v54 = vfloor.f32 %v222_v38  ;;  %vm1029_vm1 = vcmp.lt.s32.totalorder %v222_v38, 0 }
 0xd18   :  { %282 = vadd.xlane.f32.xlu1 %v278_v35  ;;  %349 = vadd.xlane.f32.xlu2 %v344_v23  ;;  %v1032_v63 = vsel %vm1029_vm1, %v1030_v52, %v1031_v54 }
 0xd19   :  { %v1033_v7 = vcvt.f32.s32 %v1032_v63 }
 0xd1b   :  { %vm1458_vm3 = vcmp.eq.s32.totalorder %v1246_v17, %v1033_v7 }
 0xd1d   :  { %v219_v41 = vpop.xlane.xlu0 %218 }
 0xd1e   :  { %v1025_v57 = vceil.f32 %v219_v41  ;;  %v1026_v58 = vfloor.f32 %v219_v41  ;;  %vm1024_vm11 = vcmp.lt.s32.totalorder %v219_v41, 0 }
 0xd20   :  { %477 = vadd.xlane.f32.xlu1 %v472_v24  ;;  %413 = vadd.xlane.f32.xlu2 %v408_v11  ;;  %v1027_v8 = vsel %vm1024_vm11, %v1025_v57, %v1026_v58 }
 0xd21   :  { %v1028_v35 = vcvt.f32.s32 %v1027_v8 }
 0xd25   :  { %v347_v45 = vpop.xlane.xlu0 %346 }
 0xd26   :  { %vm1044_vm8 = vcmp.lt.s32.totalorder %v347_v45, 0  ;;  %v1045_v12 = vceil.f32 %v347_v45  ;;  %v1046_v43 = vfloor.f32 %v347_v45 }
 0xd28   :  { %474 = vadd.xlane.f32.xlu1 %v470_v19  ;;  %410 = vadd.xlane.f32.xlu2 %v406_v46  ;;  %v1047_v19 = vsel %vm1044_vm8, %v1045_v12, %v1046_v43  ;;  %v1209_v46 = vmov 0.0  }
 0xd2d   :  { %v542_v0 = vpop.xlane.xlu0 %541 }
 0xd2e   :  { %v1080_v14 = vceil.f32 %v542_v0  ;;  %v1081_v21 = vfloor.f32 %v542_v0  ;;  %vm1079_vm14 = vcmp.lt.s32.totalorder %v542_v0, 0 }
 0xd30   :  { %669 = vadd.xlane.f32.xlu1 %v664_v55  ;;  %605 = vadd.xlane.f32.xlu2 %v600_v16 }
 0xd38   :  { %666 = vadd.xlane.f32.xlu1 %v662_v61  ;;  %602 = vadd.xlane.f32.xlu2 %v598_v25  ;;  %v1082_v61 = vsel %vm1079_vm14, %v1080_v14, %v1081_v21  ;;  %v539_v25 = vpop.xlane.xlu0 %538 }
 0xd39   :  { %vm1074_vm11 = vcmp.lt.s32.totalorder %v539_v25, 0 }
 0xd7b   :  { %v716_v27 = vpop.xlane.xlu1 %715 }
 0xd7c   :  { %v717_v30 = vcvt.f32.s32 %v716_v27 }
 0xd7e   :  { %v720_v31 = vadd.s32 %v719_v28, %v717_v30  ;;  %v977_v28 = vsel %vm1458_vm3, 1.0, %v1209_v46 }
 0xd80   :  { %vm724_vm6 = vcmp.eq.s32.totalorder %v1249_v18, %v720_v31 }
 0xd81   :  { %v728_v3 = vsel %vm724_vm6, %v1122_v6, 0.0  ;;  %vm1473_vm6 = vcmp.eq.s32.totalorder %v1246_v17, %v1028_v35 }
 0xd82   :  { %733 = vadd.xlane.f32.xlu0 %v728_v3  ;;  %v976_v54 = vsel %vm1473_vm6, 1.0, %v1209_v46 }
 0xd83   :  { %v700_v33 = vpop.xlane.xlu2 %699  ;;  %v286_v39 = vpop.xlane.xlu1 %285 }
 0xd84   :  { %v701_v36 = vcvt.f32.s32 %v700_v33  ;;  %v1040_v48 = vceil.f32 %v286_v39  ;;  %v1041_v50 = vfloor.f32 %v286_v39  ;;  %vm1039_vm13 = vcmp.lt.s32.totalorder %v286_v39, 0 }
 0xd86   :  { %v704_v37 = vadd.s32 %v703_v34, %v701_v36  ;;  %v1042_v59 = vsel %vm1039_vm13, %v1040_v48, %v1041_v50  ;;  %v1048_v36 = vcvt.f32.s32 %v1047_v19 }
 0xd88   :  { %vm722_vm7 = vcmp.eq.s32.totalorder %v1249_v18, %v704_v37  ;;  %v1083_v37 = vcvt.f32.s32 %v1082_v61 }
 0xd89   :  { %v726_v9 = vsel %vm722_vm7, %v1122_v6, 0.0  ;;  %v1043_v6 = vcvt.f32.s32 %v1042_v59 }
 0xd8a   :  { %730 = vadd.xlane.f32.xlu2 %v726_v9  ;;  %v1075_v9 = vceil.f32 %v539_v25 }
 0xd8b   :  { %v350_v40 = vpop.xlane.xlu2 %349  ;;  %v283_v42 = vpop.xlane.xlu1 %282  ;;  %vm800_vm9 = vcmp.eq.s32.totalorder %v1246_v17, %v1043_v6 }
 0xd8c   :  { %v1050_v56 = vceil.f32 %v350_v40  ;;  %v1051_v18 = vfloor.f32 %v350_v40  ;;  %vm1049_vm10 = vcmp.lt.s32.totalorder %v350_v40, 0  ;;  %v1035_v1 = vceil.f32 %v283_v42 }
 0xd8d   :  { %v1036_v2 = vfloor.f32 %v283_v42  ;;  %vm1034_vm5 = vcmp.lt.s32.totalorder %v283_v42, 0  ;;  %v979_v55 = vsel %vm800_vm9, 1.0, %v1209_v46 }
 0xd8e   :  { %v1052_v4 = vsel %vm1049_vm10, %v1050_v56, %v1051_v18  ;;  %v806_v3 = vadd.f32 %v979_v55, %v977_v28 }
 0xd8f   :  { %v1053_v13 = vcvt.f32.s32 %v1052_v4  ;;  %v1037_v49 = vsel %vm1034_vm5, %v1035_v1, %v1036_v2  ;;  %vm809_vm5 = vcmp.eq.s32.totalorder %v1246_v17, %v1048_v36 }
 0xd90   :  { %v1038_v23 = vcvt.f32.s32 %v1037_v49  ;;  %v980_v4 = vsel %vm809_vm5, 1.0, %v1209_v46  ;;  %vm920_vm5 = vcmask 122880  }
 0xd91   :  { %vm810_vm15 = vcmp.eq.s32.totalorder %v1246_v17, %v1053_v13 }
 0xd92   :  { %v981_v31 = vsel %vm810_vm15, 1.0, %v1209_v46  ;;  %vm799_vm13 = vcmp.eq.s32.totalorder %v1246_v17, %v1038_v23 }
 0xd93   :  { %v414_v44 = vpop.xlane.xlu2 %413  ;;  %v478_v47 = vpop.xlane.xlu1 %477  ;;  %v816_v39 = vadd.f32 %v981_v31, %v806_v3  ;;  %v978_v45 = vsel %vm799_vm13, 1.0, %v1209_v46 }
 0xd94   :  { %v1060_v60 = vceil.f32 %v414_v44  ;;  %v1061_v62 = vfloor.f32 %v414_v44  ;;  %vm1059_vm4 = vcmp.lt.s32.totalorder %v414_v44, 0  ;;  %v1070_v15 = vceil.f32 %v478_v47 }
 0xd95   :  { %v1071_v20 = vfloor.f32 %v478_v47  ;;  %vm1069_vm2 = vcmp.lt.s32.totalorder %v478_v47, 0  ;;  %v1076_v44 = vfloor.f32 %v539_v25  ;;  %v805_v59 = vadd.f32 %v978_v45, %v976_v54 }
 0xd96   :  { %v1062_v10 = vsel %vm1059_vm4, %v1060_v60, %v1061_v62 }
 0xd97   :  { %v1063_v29 = vcvt.f32.s32 %v1062_v10  ;;  %v1072_v16 = vsel %vm1069_vm2, %v1070_v15, %v1071_v20  ;;  %vm840_vm2 = vcmp.eq.s32.totalorder %v1246_v17, %v1083_v37  ;;  %v1077_v62 = vsel %vm1074_vm11, %v1075_v9, %v1076_v44 }
 0xd98   :  { %v1073_v33 = vcvt.f32.s32 %v1072_v16  ;;  %v987_v7 = vsel %vm840_vm2, 1.0, %v1209_v46  ;;  %v1078_v8 = vcvt.f32.s32 %v1077_v62  ;;  %v815_v10 = vadd.f32 %v980_v4, %v805_v59 }
 0xd99   :  { %vm820_vm0 = vcmp.eq.s32.totalorder %v1246_v17, %v1063_v29 }
 0xd9a   :  { %v983_v38 = vsel %vm820_vm0, 1.0, %v1209_v46  ;;  %vm830_vm10 = vcmp.eq.s32.totalorder %v1246_v17, %v1073_v33  ;;  %vm839_vm6 = vcmp.eq.s32.totalorder %v1246_v17, %v1078_v8 }
 0xd9b   :  { %v1452_v51 = vpop.xlane.xlu2 %410  ;;  %v1454_v5 = vpop.xlane.xlu1 %474  ;;  %v826_v50 = vadd.f32 %v983_v38, %v816_v39  ;;  %v985_v60 = vsel %vm830_vm10, 1.0, %v1209_v46  ;;  %v986_v25 = vsel %vm839_vm6, 1.0, %v1209_v46 }
 0xd9c   :  { %v1055_v24 = vceil.f32 %v1452_v51  ;;  %v1056_v11 = vfloor.f32 %v1452_v51  ;;  %vm1054_vm12 = vcmp.lt.s32.totalorder %v1452_v51, 0  ;;  %v1065_v40 = vceil.f32 %v1454_v5 }
 0xd9d   :  { %v1066_v41 = vfloor.f32 %v1454_v5  ;;  %vm1064_vm1 = vcmp.lt.s32.totalorder %v1454_v5, 0  ;;  %v836_v63 = vadd.f32 %v985_v60, %v826_v50 }
 0xd9e   :  { %v1057_v34 = vsel %vm1054_vm12, %v1055_v24, %v1056_v11 }
 0xd9f   :  { %v1058_v47 = vcvt.f32.s32 %v1057_v34  ;;  %v1067_v18 = vsel %vm1064_vm1, %v1065_v40, %v1066_v41  ;;  %v846_v49 = vadd.f32 %v987_v7, %v836_v63 }
 0xda0   :  { %v1068_v1 = vcvt.f32.s32 %v1067_v18  ;;  %v1210_v18 = vmov 1.0  }
 0xda1   :  { %vm819_vm8 = vcmp.eq.s32.totalorder %v1246_v17, %v1058_v47 }
 0xda2   :  { %v982_v5 = vsel %vm819_vm8, 1.0, %v1209_v46  ;;  %vm829_vm14 = vcmp.eq.s32.totalorder %v1246_v17, %v1068_v1 }
 0xda3   :  { %v606_v53 = vpop.xlane.xlu2 %605  ;;  %v670_v32 = vpop.xlane.xlu1 %669  ;;  %v825_v15 = vadd.f32 %v982_v5, %v815_v10  ;;  %v984_v35 = vsel %vm829_vm14, 1.0, %v1209_v46 }
 0xda4   :  { %v1090_v26 = vceil.f32 %v606_v53  ;;  %v1091_v27 = vfloor.f32 %v606_v53  ;;  %vm1089_vm7 = vcmp.lt.s32.totalorder %v606_v53, 0  ;;  %v1100_v51 = vceil.f32 %v670_v32 }
 0xda5   :  { %v1101_v52 = vfloor.f32 %v670_v32  ;;  %vm1099_vm4 = vcmp.lt.s32.totalorder %v670_v32, 0  ;;  %v835_v11 = vadd.f32 %v984_v35, %v825_v15 }
 0xda6   :  { %v1092_v42 = vsel %vm1089_vm7, %v1090_v26, %v1091_v27 }
 0xda7   :  { %v1093_v56 = vcvt.f32.s32 %v1092_v42  ;;  %v1102_v0 = vsel %vm1099_vm4, %v1100_v51, %v1101_v52  ;;  %v845_v28 = vadd.f32 %v986_v25, %v835_v11  ;;  %vm889_vm4 = vcmask 154624  }
 0xda8   :  { %v1103_v12 = vcvt.f32.s32 %v1102_v0 }
 0xda9   :  { %vm850_vm3 = vcmp.eq.s32.totalorder %v1246_v17, %v1093_v56 }
 0xdaa   :  { %v989_v43 = vsel %vm850_vm3, 1.0, %v1209_v46  ;;  %vm860_vm0 = vcmp.eq.s32.totalorder %v1246_v17, %v1103_v12 }
 0xdab   :  { %v603_v48 = vpop.xlane.xlu2 %602  ;;  %v667_v2 = vpop.xlane.xlu1 %666  ;;  %v856_v22 = vadd.f32 %v989_v43, %v846_v49  ;;  %v991_v55 = vsel %vm860_vm0, 1.0, %v1209_v46 }
 0xdac   :  { %v1085_v57 = vceil.f32 %v603_v48  ;;  %v1086_v58 = vfloor.f32 %v603_v48  ;;  %vm1084_vm9 = vcmp.lt.s32.totalorder %v603_v48, 0  ;;  %v1095_v13 = vceil.f32 %v667_v2 }
 0xdad   :  { %v1096_v14 = vfloor.f32 %v667_v2  ;;  %vm1094_vm15 = vcmp.lt.s32.totalorder %v667_v2, 0  ;;  %v866_v61 = vadd.f32 %v991_v55, %v856_v22 }
 0xdae   :  { %v1087_v6 = vsel %vm1084_vm9, %v1085_v57, %v1086_v58 }
 0xdaf   :  { %v1088_v20 = vcvt.f32.s32 %v1087_v6  ;;  %v1097_v23 = vsel %vm1094_vm15, %v1095_v13, %v1096_v14 }
 0xdb0   :  { %v1098_v16 = vcvt.f32.s32 %v1097_v23 }
 0xdb1   :  { %vm849_vm7 = vcmp.eq.s32.totalorder %v1246_v17, %v1088_v20 }
 0xdb2   :  { %v988_v26 = vsel %vm849_vm7, 1.0, %v1209_v46  ;;  %vm859_vm10 = vcmp.eq.s32.totalorder %v1246_v17, %v1098_v16 }
 0xdb3   :  { %v855_v33 = vadd.f32 %v988_v26, %v845_v28  ;;  %v990_v38 = vsel %vm859_vm10, 1.0, %v1209_v46 }
 0xdb5   :  { %v865_v39 = vadd.f32 %v990_v38, %v855_v33 }
 0xdf5   :  { %v734_v53 = vpop.xlane.xlu0 %733 }
 0xdf6   :  { %vm1109_vm12 = vcmp.lt.s32.totalorder %v734_v53, 0  ;;  %v1110_v21 = vceil.f32 %v734_v53  ;;  %v1111_v29 = vfloor.f32 %v734_v53 }
 0xdf8   :  { %v1112_v24 = vsel %vm1109_vm12, %v1110_v21, %v1111_v29 }
 0xdf9   :  { %v1113_v19 = vcvt.f32.s32 %v1112_v24 }
 0xdfb   :  { %vm870_vm13 = vcmp.eq.s32.totalorder %v1246_v17, %v1113_v19 }
 0xdfc   :  { %v993_v27 = vsel %vm870_vm13, 1.0, %v1209_v46 }
 0xdfd   :  { %v731_v30 = vpop.xlane.xlu2 %730  ;;  %v876_v31 = vadd.f32 %v993_v27, %v866_v61 }
 0xdfe   :  { %vm1104_vm1 = vcmp.lt.s32.totalorder %v731_v30, 0  ;;  %v1105_v32 = vceil.f32 %v731_v30  ;;  %v1106_v3 = vfloor.f32 %v731_v30 }
 0xdff   :  { %v878_v34 = vmul.f32 0.11111111, %v876_v31 }
 0xe00   :  { %v1107_v36 = vsel %vm1104_vm1, %v1105_v32, %v1106_v3 }
 0xe01   :  { %v1108_v37 = vcvt.f32.s32 %v1107_v36  ;;  %v882_v9 = vadd.f32 1e-06, %v878_v34  ;;  %v880_v47 = vsub.f32 0.0, %v878_v34 }
 0xe03   :  { %vm869_vm11 = vcmp.eq.s32.totalorder %v1246_v17, %v1108_v37  ;;  %1123 = vlog2.f32 %v882_v9 }
 0xe04   :  { %v992_v40 = vsel %vm869_vm11, 1.0, %v1209_v46 }
 0xe05   :  { %v875_v41 = vadd.f32 %v992_v40, %v865_v39 }
 0xe07   :  { %v877_v42 = vmul.f32 0.11111111, %v875_v41 }
 0xe09   :  { %v1124_v44 = vpop.eup %1123  ;;  %v881_v45 = vadd.f32 1e-06, %v877_v42  ;;  %v879_v52 = vsub.f32 0.0, %v877_v42 }
 0xe0a   :  { %v886_v48 = vmul.f32 0.6931472, %v1124_v44 }
 0xe0b   :  { %1125 = vlog2.f32 %v881_v45 }
 0xe0c   :  { %v888_v50 = vmul.f32 %v886_v48, %v880_v47 }
 0xe0e   :  { %994 = vmatpush.xpose.msk.msra.mxu1 %vm889_vm4, %v888_v50 }
 0xe11   :  { %v1126_v51 = vpop.eup %1125 }
 0xe12   :  { %v884_v54 = vmul.f32 0.6931472, %v1126_v51 }
 0xe14   :  { %v887_v56 = vmul.f32 %v884_v54, %v879_v52 }
 0xe16   :  { %995 = vmatpush.xpose.msk.msra.mxu1 %vm889_vm4, %v887_v56 }
 0xe19   :  { %996 = vmatmul.msk.f32.vlgmr.msra.gmra.mxu1 %vm889_vm4, %v1210_v18 }
 0xe96   :  { %v916_v17 = vpop.f32.mrf.mxu1 }
 0xe97   :  { %v919_v46 = vmul.f32 0.33962327, %v916_v17 }
 0xe99   :  { %921 = vst.msk [vmem:[#allocation9] sm:$0x1] %vm920_vm5, %v919_v46 }
 0xe9a   :  { %932 = dma.vmem_to_hbm [thread:$0]  %s928_s28, 16, %s930_s5, [#allocation6]  }
 0xe9b   :  { %1203 = dma.done.wait [#allocation6], 16  }
 0xe9c   :  { %1204 = vsyncadd [#allocation6], 4294967280 }
 0xe9d   :  { %937 = vsyncpa [#allocation5], 1 }
 0xe9e   :  { %938 = vsyncpa [#allocation8], 1 }
 0xe9f   :  { %939 = vsyncpa [#allocation6], 1 }

</bundles_post_ra>
